<compile_context>
chip_gen: v5e
topology: v5e:2x2
jax: 0.10.0
libtpu: 0.0.40
codegen_flags: <defaults>
</compile_context>

<pallas_src>
import functools
import math

import jax
import jax.numpy as jnp
from jax.experimental import pallas as pl
from jax.experimental.pallas import tpu as pltpu


# ----------------------------- kernel ---------------------------------------


def _encoder_layer_kernel(
    x_ref, bias_ref,
    g1_ref, be1_ref,
    wq_ref, bq_ref, wk_ref, bk_ref, wv_ref, bv_ref, wo_ref, bo_ref,
    g2_ref, be2_ref,
    w1_ref, bb1_ref, w2_ref, bb2_ref,
    o_ref,
    ctx_ref,                      # VMEM scratch (Bt*S, D) f32
    *, Bt, S, D, H, d_ff, tff,
):
    dk = D // H
    scale = 1.0 / math.sqrt(dk)
    rows = Bt * S
    f32 = jnp.float32
    wdt = wq_ref.dtype            # weight dtype (bf16)

    x = x_ref[...].reshape(rows, D)                      # (rows, D) f32

    def layer_norm(v, g, b):
        # PyTorch nn.LayerNorm: biased variance, eps=1e-5
        mu = jnp.mean(v, axis=-1, keepdims=True)
        var = jnp.mean((v - mu) ** 2, axis=-1, keepdims=True)
        return (v - mu) * jax.lax.rsqrt(var + 1e-5) * g + b

    # --- sublayer 0: multi-headed self-attention on LN1(x) ---
    xn = layer_norm(x, g1_ref[...], be1_ref[...])
    xn_w = xn.astype(wdt)

    q = jnp.dot(xn_w, wq_ref[...], preferred_element_type=f32) + bq_ref[...]
    k = jnp.dot(xn_w, wk_ref[...], preferred_element_type=f32) + bk_ref[...]
    v = jnp.dot(xn_w, wv_ref[...], preferred_element_type=f32) + bv_ref[...]

    q = q * scale                  # fold 1/sqrt(dk) into q (rows*D mults, not H*S*S divs)

    # per-(batch, head) lane-sliced attention; ctx head slices written to VMEM scratch
    for b in range(Bt):
        bias_b = bias_ref[b]       # (1, S) additive mask (0 / -1e30)
        r0 = b * S
        for h in range(H):
            c0 = h * dk
            qh = q[r0:r0 + S, c0:c0 + dk]
            kh = k[r0:r0 + S, c0:c0 + dk]
            vh = v[r0:r0 + S, c0:c0 + dk]
            s = jax.lax.dot_general(                      # q @ k^T without materializing k^T
                qh, kh, (((1,), (1,)), ((), ())), preferred_element_type=f32)
            s = s + bias_b
            m = jnp.max(s, axis=-1, keepdims=True)
            e = jnp.exp(s - m)
            inv = pl.reciprocal(jnp.sum(e, axis=-1, keepdims=True), approx=True)
            p = e * inv
            ctx_ref[r0:r0 + S, c0:c0 + dk] = jnp.dot(
                p, vh, preferred_element_type=f32)

    ctx = ctx_ref[...]
    att = jnp.dot(ctx.astype(wdt), wo_ref[...], preferred_element_type=f32) + bo_ref[...]

    x1 = x + att                   # residual (dropout is identity in eval)

    # --- sublayer 1: position-wise feed-forward on LN2(x1), d_ff tiled ---
    xn2 = layer_norm(x1, g2_ref[...], be2_ref[...]).astype(wdt)
    ff = jnp.zeros((rows, D), dtype=f32)
    for j in range(d_ff // tff):
        c0 = j * tff
        hcol = jnp.dot(xn2, w1_ref[:, c0:c0 + tff], preferred_element_type=f32)
        hcol = jnp.maximum(hcol + bb1_ref[:, c0:c0 + tff], 0.0)
        ff = ff + jnp.dot(hcol.astype(wdt), w2_ref[c0:c0 + tff, :],
                          preferred_element_type=f32)
    ff = ff + bb2_ref[...]

    o_ref[...] = (x1 + ff).reshape(Bt, S, D)


# ----------------------------- wrapper ---------------------------------------


def _pick_block_b(B, S, target_rows=512):
    bt = max(1, min(B, max(1, target_rows // max(S, 1))))
    while B % bt:
        bt -= 1
    return bt


def _pick_ff_tile(d_ff, target=512):
    if d_ff <= target or d_ff % target != 0:
        return d_ff
    return target


def encoder_layer(x, src_mask, params, H, *, weight_dtype=jnp.bfloat16,
                  block_b=None, ff_tile=None):
    """x: (B, S, D) f32, src_mask: (B, 1, S), params: dict of weights."""
    B, S, D = x.shape
    d_ff = params['w1'].shape[1]
    assert D % H == 0

    if block_b is None:
        block_b = _pick_block_b(B, S)
    assert B % block_b == 0
    tff = ff_tile if ff_tile is not None else _pick_ff_tile(d_ff)
    assert d_ff % tff == 0

    kernel = functools.partial(_encoder_layer_kernel,
                               Bt=block_b, S=S, D=D, H=H, d_ff=d_ff, tff=tff)

    f32 = jnp.float32
    vec = lambda p: p.reshape(1, -1).astype(f32)          # 1-D params as (1, N) rows
    wcast = lambda p: p.astype(weight_dtype)              # bf16 weight matrices

    # additive mask bias: 0 where attended, -1e30 where masked (one add in-kernel,
    # no compare+select on the (S,S) scores, no -inf NaN hazard for all-masked rows).
    mask_bias = jnp.where(src_mask == 0, -1e30, 0.0).astype(f32)   # (B, 1, S)

    # Weights never change across the batch grid -> single pipeline buffer.
    def wspec(shape):
        return pl.BlockSpec(shape, lambda b: (0, 0), pipeline_mode=pl.Buffered(1))

    in_specs = [
        pl.BlockSpec((block_b, S, D), lambda b: (b, 0, 0)),   # x
        pl.BlockSpec((block_b, 1, S), lambda b: (b, 0, 0)),   # additive mask bias
        wspec((1, D)), wspec((1, D)),                         # LN1 gamma, beta
        wspec((D, D)), wspec((1, D)),                         # Wq, bq
        wspec((D, D)), wspec((1, D)),                         # Wk, bk
        wspec((D, D)), wspec((1, D)),                         # Wv, bv
        wspec((D, D)), wspec((1, D)),                         # Wo, bo
        wspec((1, D)), wspec((1, D)),                         # LN2 gamma, beta
        wspec((D, d_ff)), wspec((1, d_ff)),                   # W1, b1
        wspec((d_ff, D)), wspec((1, D)),                      # W2, b2
    ]

    # VMEM budget: bf16 weights (single buffer) + activations + double-buffered x / out.
    rows = block_b * S
    wbytes = (4 * D * D + 2 * D * d_ff) * jnp.dtype(weight_dtype).itemsize
    act_bytes = 4 * rows * (10 * D + tff) + 4 * S * S * 4
    io_bytes = 2 * 2 * (rows * D * 4 + block_b * S * 4)
    est = wbytes + act_bytes + io_bytes + (2 << 20)
    # clamp to 64 MiB so the limit stays valid on v7x; raise on v5e/v6e for huge configs.
    vmem_limit = int(min(max(est, 32 * 1024 * 1024), 64 * 1024 * 1024))

    cost = pl.CostEstimate(
        flops=2 * B * S * (4 * D * D + 2 * S * D + 2 * D * d_ff),
        transcendentals=B * H * S * S,
        bytes_accessed=wbytes + 2 * B * S * D * 4 + B * S * 4,
    )

    fn = pl.pallas_call(
        kernel,
        out_shape=jax.ShapeDtypeStruct((B, S, D), f32),
        grid=(B // block_b,),
        in_specs=in_specs,
        out_specs=pl.BlockSpec((block_b, S, D), lambda b: (b, 0, 0)),
        scratch_shapes=[pltpu.VMEM((rows, D), f32)],
        compiler_params=pltpu.CompilerParams(
            dimension_semantics=("parallel",),
            vmem_limit_bytes=vmem_limit,
        ),
        cost_estimate=cost,
    )

    return fn(
        x.astype(f32), mask_bias,
        vec(params['ln1_g']), vec(params['ln1_b']),
        wcast(params['wq']), vec(params['bq']),
        wcast(params['wk']), vec(params['bk']),
        wcast(params['wv']), vec(params['bv']),
        wcast(params['wo']), vec(params['bo']),
        vec(params['ln2_g']), vec(params['ln2_b']),
        wcast(params['w1']), vec(params['b1']),
        wcast(params['w2']), vec(params['b2']),
    )


# ----------------------------- reference (pure JAX) ---------------------------


def encoder_layer_ref(x, src_mask, params, H, matmul_dtype=None):
    """Pure-JAX reference. matmul_dtype=bfloat16 mirrors the kernel's mixed precision."""
    B, S, D = x.shape
    dk = D // H
    f32 = jnp.float32

    def mm(a, b):
        if matmul_dtype is not None:
            a = a.astype(matmul_dtype)
            b = b.astype(matmul_dtype)
        return jnp.dot(a, b, preferred_element_type=f32)

    def ln(v, g, b):
        mu = jnp.mean(v, -1, keepdims=True)
        var = jnp.mean((v - mu) ** 2, -1, keepdims=True)
        return (v - mu) * jax.lax.rsqrt(var + 1e-5) * g + b

    bias = jnp.where(src_mask == 0, -1e30, 0.0).astype(f32)   # (B, 1, S)

    xn = ln(x, params['ln1_g'], params['ln1_b'])
    q = mm(xn, params['wq']) + params['bq']
    k = mm(xn, params['wk']) + params['bk']
    v = mm(xn, params['wv']) + params['bv']
    q = q.reshape(B, S, H, dk).transpose(0, 2, 1, 3)
    k = k.reshape(B, S, H, dk).transpose(0, 2, 1, 3)
    v = v.reshape(B, S, H, dk).transpose(0, 2, 1, 3)
    sc = jnp.einsum('bhqd,bhkd->bhqk', q, k,
                    preferred_element_type=f32) / math.sqrt(dk)
    sc = sc + bias[:, None, :, :]
    p = jax.nn.softmax(sc, axis=-1)
    ctx = jnp.einsum('bhqk,bhkd->bhqd', p, v, preferred_element_type=f32)
    ctx = ctx.transpose(0, 2, 1, 3).reshape(B, S, D)
    x1 = x + mm(ctx, params['wo']) + params['bo']
    xn2 = ln(x1, params['ln2_g'], params['ln2_b'])
    h1 = jnp.maximum(mm(xn2, params['w1']) + params['b1'], 0.0)
    ff = mm(h1, params['w2']) + params['b2']
    return x1 + ff


# ----------------------------- main -------------------------------------------


if __name__ == "__main__":
    B, S, D, H, d_ff = 2, 8, 32, 4, 64

    key = jax.random.PRNGKey(0)
    ks = jax.random.split(key, 16)

    def w(k, shape, scale=0.1):
        return (scale * jax.random.normal(k, shape)).astype(jnp.float32)

    params = dict(
        ln1_g=jnp.ones((D,), jnp.float32), ln1_b=jnp.zeros((D,), jnp.float32),
        wq=w(ks[0], (D, D)), bq=w(ks[1], (D,)),
        wk=w(ks[2], (D, D)), bk=w(ks[3], (D,)),
        wv=w(ks[4], (D, D)), bv=w(ks[5], (D,)),
        wo=w(ks[6], (D, D)), bo=w(ks[7], (D,)),
        ln2_g=jnp.ones((D,), jnp.float32), ln2_b=jnp.zeros((D,), jnp.float32),
        w1=w(ks[8], (D, d_ff)), b1=w(ks[9], (d_ff,)),
        w2=w(ks[10], (d_ff, D)), b2=w(ks[11], (D,)),
    )

    x = jax.random.normal(ks[12], (B, S, D), dtype=jnp.float32)
    # src_mask: (B, 1, S); keep a prefix of valid positions per batch element
    valid = jnp.array([S, S - 3], dtype=jnp.int32)
    src_mask = (jnp.arange(S)[None, None, :] < valid[:, None, None]).astype(jnp.int32)

    out = encoder_layer(x, src_mask, params, H)
    out = jax.block_until_ready(out)
    assert out.shape == (B, S, D)

    # tight check against a reference that mirrors the kernel's bf16-weight mixed precision
    ref_mixed = encoder_layer_ref(x, src_mask, params, H, matmul_dtype=jnp.bfloat16)
    assert jnp.allclose(out, ref_mixed, atol=1e-2, rtol=1e-2), \
        float(jnp.max(jnp.abs(out - ref_mixed)))

    # looser check against the full-f32 module semantics
    ref_f32 = encoder_layer_ref(x, src_mask, params, H)
    assert jnp.allclose(out, ref_f32, atol=5e-2, rtol=5e-2), \
        float(jnp.max(jnp.abs(out - ref_f32)))

    print("KERNEL_OK")
</pallas_src>

<mosaic_0001>
module attributes {stable_mosaic.version = 11 : i64} {
  func.func @_encoder_layer_kernel(%arg0: i32, %arg1: memref<2x8x32xf32, #tpu.memory_space<vmem>>, %arg2: memref<2x1x8xf32, #tpu.memory_space<vmem>>, %arg3: memref<1x32xf32, #tpu.memory_space<vmem>>, %arg4: memref<1x32xf32, #tpu.memory_space<vmem>>, %arg5: memref<32x32xbf16, #tpu.memory_space<vmem>>, %arg6: memref<1x32xf32, #tpu.memory_space<vmem>>, %arg7: memref<32x32xbf16, #tpu.memory_space<vmem>>, %arg8: memref<1x32xf32, #tpu.memory_space<vmem>>, %arg9: memref<32x32xbf16, #tpu.memory_space<vmem>>, %arg10: memref<1x32xf32, #tpu.memory_space<vmem>>, %arg11: memref<32x32xbf16, #tpu.memory_space<vmem>>, %arg12: memref<1x32xf32, #tpu.memory_space<vmem>>, %arg13: memref<1x32xf32, #tpu.memory_space<vmem>>, %arg14: memref<1x32xf32, #tpu.memory_space<vmem>>, %arg15: memref<32x64xbf16, #tpu.memory_space<vmem>>, %arg16: memref<1x64xf32, #tpu.memory_space<vmem>>, %arg17: memref<64x32xbf16, #tpu.memory_space<vmem>>, %arg18: memref<1x32xf32, #tpu.memory_space<vmem>>, %arg19: memref<2x8x32xf32, #tpu.memory_space<vmem>>, %arg20: memref<16x32xf32, #tpu.memory_space<vmem>>) attributes {dimension_semantics = [#tpu.dimension_semantics<parallel>], iteration_bounds = array<i64: 1>, scalar_prefetch = 0 : i64, scratch_operands = 1 : i64, tpu.core_type = #tpu.core_type<tc>, window_params = [{transform_indices = @transform_0, window_bounds = array<i64: 2, 8, 32>}, {transform_indices = @transform_1, window_bounds = array<i64: 2, 1, 8>}, {pipeline_mode = #tpu.pipeline_mode<synchronous>, transform_indices = @transform_2, window_bounds = array<i64: 1, 32>}, {pipeline_mode = #tpu.pipeline_mode<synchronous>, transform_indices = @transform_3, window_bounds = array<i64: 1, 32>}, {pipeline_mode = #tpu.pipeline_mode<synchronous>, transform_indices = @transform_4, window_bounds = array<i64: 32, 32>}, {pipeline_mode = #tpu.pipeline_mode<synchronous>, transform_indices = @transform_5, window_bounds = array<i64: 1, 32>}, {pipeline_mode = #tpu.pipeline_mode<synchronous>, transform_indices = @transform_6, window_bounds = array<i64: 32, 32>}, {pipeline_mode = #tpu.pipeline_mode<synchronous>, transform_indices = @transform_7, window_bounds = array<i64: 1, 32>}, {pipeline_mode = #tpu.pipeline_mode<synchronous>, transform_indices = @transform_8, window_bounds = array<i64: 32, 32>}, {pipeline_mode = #tpu.pipeline_mode<synchronous>, transform_indices = @transform_9, window_bounds = array<i64: 1, 32>}, {pipeline_mode = #tpu.pipeline_mode<synchronous>, transform_indices = @transform_10, window_bounds = array<i64: 32, 32>}, {pipeline_mode = #tpu.pipeline_mode<synchronous>, transform_indices = @transform_11, window_bounds = array<i64: 1, 32>}, {pipeline_mode = #tpu.pipeline_mode<synchronous>, transform_indices = @transform_12, window_bounds = array<i64: 1, 32>}, {pipeline_mode = #tpu.pipeline_mode<synchronous>, transform_indices = @transform_13, window_bounds = array<i64: 1, 32>}, {pipeline_mode = #tpu.pipeline_mode<synchronous>, transform_indices = @transform_14, window_bounds = array<i64: 32, 64>}, {pipeline_mode = #tpu.pipeline_mode<synchronous>, transform_indices = @transform_15, window_bounds = array<i64: 1, 64>}, {pipeline_mode = #tpu.pipeline_mode<synchronous>, transform_indices = @transform_16, window_bounds = array<i64: 64, 32>}, {pipeline_mode = #tpu.pipeline_mode<synchronous>, transform_indices = @transform_17, window_bounds = array<i64: 1, 32>}, {transform_indices = @transform_18, window_bounds = array<i64: 2, 8, 32>}]} {
    %c0 = arith.constant 0 : index
    %c0_0 = arith.constant 0 : index
    %c0_1 = arith.constant 0 : index
    %0 = vector.load %arg1[%c0, %c0_0, %c0_1] : memref<2x8x32xf32, #tpu.memory_space<vmem>>, vector<2x8x32xf32>
    %1 = vector.shape_cast %0 : vector<2x8x32xf32> to vector<16x32xf32>
    %c0_2 = arith.constant 0 : index
    %c0_3 = arith.constant 0 : index
    %2 = vector.load %arg3[%c0_2, %c0_3] : memref<1x32xf32, #tpu.memory_space<vmem>>, vector<1x32xf32>
    %c0_4 = arith.constant 0 : index
    %c0_5 = arith.constant 0 : index
    %3 = vector.load %arg4[%c0_4, %c0_5] : memref<1x32xf32, #tpu.memory_space<vmem>>, vector<1x32xf32>
    %cst = arith.constant dense<0.000000e+00> : vector<16xf32>
    %4 = vector.multi_reduction <add>, %1, %cst [1] : vector<16x32xf32> to vector<16xf32>
    %5 = vector.shape_cast %4 : vector<16xf32> to vector<16x1xf32>
    %cst_6 = arith.constant 3.200000e+01 : f32
    %6 = vector.broadcast %cst_6 : f32 to vector<16x1xf32>
    %7 = arith.divf %5, %6 : vector<16x1xf32>
    %8 = vector.broadcast %7 : vector<16x1xf32> to vector<16x32xf32>
    %9 = arith.subf %1, %8 : vector<16x32xf32>
    %10 = arith.mulf %9, %9 : vector<16x32xf32>
    %cst_7 = arith.constant dense<0.000000e+00> : vector<16xf32>
    %11 = vector.multi_reduction <add>, %10, %cst_7 [1] : vector<16x32xf32> to vector<16xf32>
    %12 = vector.shape_cast %11 : vector<16xf32> to vector<16x1xf32>
    %cst_8 = arith.constant 3.200000e+01 : f32
    %13 = vector.broadcast %cst_8 : f32 to vector<16x1xf32>
    %14 = arith.divf %12, %13 : vector<16x1xf32>
    %15 = vector.broadcast %7 : vector<16x1xf32> to vector<16x32xf32>
    %16 = arith.subf %1, %15 : vector<16x32xf32>
    %cst_9 = arith.constant 9.99999974E-6 : f32
    %17 = vector.broadcast %cst_9 : f32 to vector<16x1xf32>
    %18 = arith.addf %14, %17 : vector<16x1xf32>
    %19 = math.rsqrt %18 : vector<16x1xf32>
    %20 = vector.broadcast %19 : vector<16x1xf32> to vector<16x32xf32>
    %21 = arith.mulf %16, %20 : vector<16x32xf32>
    %22 = vector.broadcast %2 : vector<1x32xf32> to vector<16x32xf32>
    %23 = arith.mulf %21, %22 : vector<16x32xf32>
    %24 = vector.broadcast %3 : vector<1x32xf32> to vector<16x32xf32>
    %25 = arith.addf %23, %24 : vector<16x32xf32>
    %26 = arith.truncf %25 : vector<16x32xf32> to vector<16x32xbf16>
    %c0_10 = arith.constant 0 : index
    %c0_11 = arith.constant 0 : index
    %27 = vector.load %arg5[%c0_10, %c0_11] : memref<32x32xbf16, #tpu.memory_space<vmem>>, vector<32x32xbf16>
    %cst_12 = arith.constant dense<0.000000e+00> : vector<16x32xf32>
    %28 = tpu.matmul %26, %27, %cst_12 {dimension_numbers = #tpu.dot_dimension_numbers<[1], [0], [0], [1], [0, 0, 1, 1], [], []>} : vector<16x32xbf16>, vector<32x32xbf16>, vector<16x32xf32> -> vector<16x32xf32>
    %c0_13 = arith.constant 0 : index
    %c0_14 = arith.constant 0 : index
    %29 = vector.load %arg6[%c0_13, %c0_14] : memref<1x32xf32, #tpu.memory_space<vmem>>, vector<1x32xf32>
    %30 = vector.broadcast %29 : vector<1x32xf32> to vector<16x32xf32>
    %31 = arith.addf %28, %30 : vector<16x32xf32>
    %c0_15 = arith.constant 0 : index
    %c0_16 = arith.constant 0 : index
    %32 = vector.load %arg7[%c0_15, %c0_16] : memref<32x32xbf16, #tpu.memory_space<vmem>>, vector<32x32xbf16>
    %cst_17 = arith.constant dense<0.000000e+00> : vector<16x32xf32>
    %33 = tpu.matmul %26, %32, %cst_17 {dimension_numbers = #tpu.dot_dimension_numbers<[1], [0], [0], [1], [0, 0, 1, 1], [], []>} : vector<16x32xbf16>, vector<32x32xbf16>, vector<16x32xf32> -> vector<16x32xf32>
    %c0_18 = arith.constant 0 : index
    %c0_19 = arith.constant 0 : index
    %34 = vector.load %arg8[%c0_18, %c0_19] : memref<1x32xf32, #tpu.memory_space<vmem>>, vector<1x32xf32>
    %35 = vector.broadcast %34 : vector<1x32xf32> to vector<16x32xf32>
    %36 = arith.addf %33, %35 : vector<16x32xf32>
    %c0_20 = arith.constant 0 : index
    %c0_21 = arith.constant 0 : index
    %37 = vector.load %arg9[%c0_20, %c0_21] : memref<32x32xbf16, #tpu.memory_space<vmem>>, vector<32x32xbf16>
    %cst_22 = arith.constant dense<0.000000e+00> : vector<16x32xf32>
    %38 = tpu.matmul %26, %37, %cst_22 {dimension_numbers = #tpu.dot_dimension_numbers<[1], [0], [0], [1], [0, 0, 1, 1], [], []>} : vector<16x32xbf16>, vector<32x32xbf16>, vector<16x32xf32> -> vector<16x32xf32>
    %c0_23 = arith.constant 0 : index
    %c0_24 = arith.constant 0 : index
    %39 = vector.load %arg10[%c0_23, %c0_24] : memref<1x32xf32, #tpu.memory_space<vmem>>, vector<1x32xf32>
    %40 = vector.broadcast %39 : vector<1x32xf32> to vector<16x32xf32>
    %41 = arith.addf %38, %40 : vector<16x32xf32>
    %cst_25 = arith.constant 0.353553385 : f32
    %42 = vector.broadcast %cst_25 : f32 to vector<16x32xf32>
    %43 = arith.mulf %31, %42 : vector<16x32xf32>
    %c0_26 = arith.constant 0 : index
    %c0_27 = arith.constant 0 : index
    %c0_28 = arith.constant 0 : index
    %44 = vector.load %arg2[%c0_26, %c0_27, %c0_28] : memref<2x1x8xf32, #tpu.memory_space<vmem>>, vector<1x1x8xf32>
    %45 = vector.shape_cast %44 : vector<1x1x8xf32> to vector<1x8xf32>
    %46 = vector.extract_strided_slice %43 {offsets = [0, 0], sizes = [8, 8], strides = [1, 1]} : vector<16x32xf32> to vector<8x8xf32>
    %47 = vector.extract_strided_slice %36 {offsets = [0, 0], sizes = [8, 8], strides = [1, 1]} : vector<16x32xf32> to vector<8x8xf32>
    %48 = vector.extract_strided_slice %41 {offsets = [0, 0], sizes = [8, 8], strides = [1, 1]} : vector<16x32xf32> to vector<8x8xf32>
    %cst_29 = arith.constant dense<0.000000e+00> : vector<8x8xf32>
    %49 = tpu.matmul %46, %47, %cst_29 {dimension_numbers = #tpu.dot_dimension_numbers<[1], [1], [0], [0], [0, 0, 1, 0], [], []>} : vector<8x8xf32>, vector<8x8xf32>, vector<8x8xf32> -> vector<8x8xf32>
    %50 = vector.broadcast %45 : vector<1x8xf32> to vector<8x8xf32>
    %51 = arith.addf %49, %50 : vector<8x8xf32>
    %cst_30 = arith.constant dense<0xFF800000> : vector<8xf32>
    %52 = vector.multi_reduction <maximumf>, %51, %cst_30 [1] : vector<8x8xf32> to vector<8xf32>
    %53 = vector.shape_cast %52 : vector<8xf32> to vector<8x1xf32>
    %54 = vector.broadcast %53 : vector<8x1xf32> to vector<8x8xf32>
    %55 = arith.subf %51, %54 : vector<8x8xf32>
    %56 = math.exp %55 : vector<8x8xf32>
    %cst_31 = arith.constant dense<0.000000e+00> : vector<8xf32>
    %57 = vector.multi_reduction <add>, %56, %cst_31 [1] : vector<8x8xf32> to vector<8xf32>
    %58 = vector.shape_cast %57 : vector<8xf32> to vector<8x1xf32>
    %59 = tpu.reciprocal %58 {approx = true} : vector<8x1xf32> -> vector<8x1xf32>
    %60 = vector.broadcast %59 : vector<8x1xf32> to vector<8x8xf32>
    %61 = arith.mulf %56, %60 : vector<8x8xf32>
    %cst_32 = arith.constant dense<0.000000e+00> : vector<8x8xf32>
    %62 = tpu.matmul %61, %48, %cst_32 {dimension_numbers = #tpu.dot_dimension_numbers<[1], [0], [0], [1], [0, 0, 1, 1], [], []>} : vector<8x8xf32>, vector<8x8xf32>, vector<8x8xf32> -> vector<8x8xf32>
    %c0_33 = arith.constant 0 : index
    %c0_34 = arith.constant 0 : index
    %63 = vector.load %arg20[%c0_33, %c0_34] : memref<16x32xf32, #tpu.memory_space<vmem>>, vector<8x8xf32>
    tpu.vector_store %arg20[%c0_33, %c0_34], %62 {strides = array<i32>} : memref<16x32xf32, #tpu.memory_space<vmem>>, vector<8x8xf32>,
    %64 = vector.extract_strided_slice %43 {offsets = [0, 8], sizes = [8, 8], strides = [1, 1]} : vector<16x32xf32> to vector<8x8xf32>
    %65 = vector.extract_strided_slice %36 {offsets = [0, 8], sizes = [8, 8], strides = [1, 1]} : vector<16x32xf32> to vector<8x8xf32>
    %66 = vector.extract_strided_slice %41 {offsets = [0, 8], sizes = [8, 8], strides = [1, 1]} : vector<16x32xf32> to vector<8x8xf32>
    %cst_35 = arith.constant dense<0.000000e+00> : vector<8x8xf32>
    %67 = tpu.matmul %64, %65, %cst_35 {dimension_numbers = #tpu.dot_dimension_numbers<[1], [1], [0], [0], [0, 0, 1, 0], [], []>} : vector<8x8xf32>, vector<8x8xf32>, vector<8x8xf32> -> vector<8x8xf32>
    %68 = vector.broadcast %45 : vector<1x8xf32> to vector<8x8xf32>
    %69 = arith.addf %67, %68 : vector<8x8xf32>
    %cst_36 = arith.constant dense<0xFF800000> : vector<8xf32>
    %70 = vector.multi_reduction <maximumf>, %69, %cst_36 [1] : vector<8x8xf32> to vector<8xf32>
    %71 = vector.shape_cast %70 : vector<8xf32> to vector<8x1xf32>
    %72 = vector.broadcast %71 : vector<8x1xf32> to vector<8x8xf32>
    %73 = arith.subf %69, %72 : vector<8x8xf32>
    %74 = math.exp %73 : vector<8x8xf32>
    %cst_37 = arith.constant dense<0.000000e+00> : vector<8xf32>
    %75 = vector.multi_reduction <add>, %74, %cst_37 [1] : vector<8x8xf32> to vector<8xf32>
    %76 = vector.shape_cast %75 : vector<8xf32> to vector<8x1xf32>
    %77 = tpu.reciprocal %76 {approx = true} : vector<8x1xf32> -> vector<8x1xf32>
    %78 = vector.broadcast %77 : vector<8x1xf32> to vector<8x8xf32>
    %79 = arith.mulf %74, %78 : vector<8x8xf32>
    %cst_38 = arith.constant dense<0.000000e+00> : vector<8x8xf32>
    %80 = tpu.matmul %79, %66, %cst_38 {dimension_numbers = #tpu.dot_dimension_numbers<[1], [0], [0], [1], [0, 0, 1, 1], [], []>} : vector<8x8xf32>, vector<8x8xf32>, vector<8x8xf32> -> vector<8x8xf32>
    %c0_39 = arith.constant 0 : index
    %c8 = arith.constant 8 : index
    %81 = vector.load %arg20[%c0_39, %c8] : memref<16x32xf32, #tpu.memory_space<vmem>>, vector<8x8xf32>
    tpu.vector_store %arg20[%c0_39, %c8], %80 {strides = array<i32>} : memref<16x32xf32, #tpu.memory_space<vmem>>, vector<8x8xf32>,
    %82 = vector.extract_strided_slice %43 {offsets = [0, 16], sizes = [8, 8], strides = [1, 1]} : vector<16x32xf32> to vector<8x8xf32>
    %83 = vector.extract_strided_slice %36 {offsets = [0, 16], sizes = [8, 8], strides = [1, 1]} : vector<16x32xf32> to vector<8x8xf32>
    %84 = vector.extract_strided_slice %41 {offsets = [0, 16], sizes = [8, 8], strides = [1, 1]} : vector<16x32xf32> to vector<8x8xf32>
    %cst_40 = arith.constant dense<0.000000e+00> : vector<8x8xf32>
    %85 = tpu.matmul %82, %83, %cst_40 {dimension_numbers = #tpu.dot_dimension_numbers<[1], [1], [0], [0], [0, 0, 1, 0], [], []>} : vector<8x8xf32>, vector<8x8xf32>, vector<8x8xf32> -> vector<8x8xf32>
    %86 = vector.broadcast %45 : vector<1x8xf32> to vector<8x8xf32>
    %87 = arith.addf %85, %86 : vector<8x8xf32>
    %cst_41 = arith.constant dense<0xFF800000> : vector<8xf32>
    %88 = vector.multi_reduction <maximumf>, %87, %cst_41 [1] : vector<8x8xf32> to vector<8xf32>
    %89 = vector.shape_cast %88 : vector<8xf32> to vector<8x1xf32>
    %90 = vector.broadcast %89 : vector<8x1xf32> to vector<8x8xf32>
    %91 = arith.subf %87, %90 : vector<8x8xf32>
    %92 = math.exp %91 : vector<8x8xf32>
    %cst_42 = arith.constant dense<0.000000e+00> : vector<8xf32>
    %93 = vector.multi_reduction <add>, %92, %cst_42 [1] : vector<8x8xf32> to vector<8xf32>
    %94 = vector.shape_cast %93 : vector<8xf32> to vector<8x1xf32>
    %95 = tpu.reciprocal %94 {approx = true} : vector<8x1xf32> -> vector<8x1xf32>
    %96 = vector.broadcast %95 : vector<8x1xf32> to vector<8x8xf32>
    %97 = arith.mulf %92, %96 : vector<8x8xf32>
    %cst_43 = arith.constant dense<0.000000e+00> : vector<8x8xf32>
    %98 = tpu.matmul %97, %84, %cst_43 {dimension_numbers = #tpu.dot_dimension_numbers<[1], [0], [0], [1], [0, 0, 1, 1], [], []>} : vector<8x8xf32>, vector<8x8xf32>, vector<8x8xf32> -> vector<8x8xf32>
    %c0_44 = arith.constant 0 : index
    %c16 = arith.constant 16 : index
    %99 = vector.load %arg20[%c0_44, %c16] : memref<16x32xf32, #tpu.memory_space<vmem>>, vector<8x8xf32>
    tpu.vector_store %arg20[%c0_44, %c16], %98 {strides = array<i32>} : memref<16x32xf32, #tpu.memory_space<vmem>>, vector<8x8xf32>,
    %100 = vector.extract_strided_slice %43 {offsets = [0, 24], sizes = [8, 8], strides = [1, 1]} : vector<16x32xf32> to vector<8x8xf32>
    %101 = vector.extract_strided_slice %36 {offsets = [0, 24], sizes = [8, 8], strides = [1, 1]} : vector<16x32xf32> to vector<8x8xf32>
    %102 = vector.extract_strided_slice %41 {offsets = [0, 24], sizes = [8, 8], strides = [1, 1]} : vector<16x32xf32> to vector<8x8xf32>
    %cst_45 = arith.constant dense<0.000000e+00> : vector<8x8xf32>
    %103 = tpu.matmul %100, %101, %cst_45 {dimension_numbers = #tpu.dot_dimension_numbers<[1], [1], [0], [0], [0, 0, 1, 0], [], []>} : vector<8x8xf32>, vector<8x8xf32>, vector<8x8xf32> -> vector<8x8xf32>
    %104 = vector.broadcast %45 : vector<1x8xf32> to vector<8x8xf32>
    %105 = arith.addf %103, %104 : vector<8x8xf32>
    %cst_46 = arith.constant dense<0xFF800000> : vector<8xf32>
    %106 = vector.multi_reduction <maximumf>, %105, %cst_46 [1] : vector<8x8xf32> to vector<8xf32>
    %107 = vector.shape_cast %106 : vector<8xf32> to vector<8x1xf32>
    %108 = vector.broadcast %107 : vector<8x1xf32> to vector<8x8xf32>
    %109 = arith.subf %105, %108 : vector<8x8xf32>
    %110 = math.exp %109 : vector<8x8xf32>
    %cst_47 = arith.constant dense<0.000000e+00> : vector<8xf32>
    %111 = vector.multi_reduction <add>, %110, %cst_47 [1] : vector<8x8xf32> to vector<8xf32>
    %112 = vector.shape_cast %111 : vector<8xf32> to vector<8x1xf32>
    %113 = tpu.reciprocal %112 {approx = true} : vector<8x1xf32> -> vector<8x1xf32>
    %114 = vector.broadcast %113 : vector<8x1xf32> to vector<8x8xf32>
    %115 = arith.mulf %110, %114 : vector<8x8xf32>
    %cst_48 = arith.constant dense<0.000000e+00> : vector<8x8xf32>
    %116 = tpu.matmul %115, %102, %cst_48 {dimension_numbers = #tpu.dot_dimension_numbers<[1], [0], [0], [1], [0, 0, 1, 1], [], []>} : vector<8x8xf32>, vector<8x8xf32>, vector<8x8xf32> -> vector<8x8xf32>
    %c0_49 = arith.constant 0 : index
    %c24 = arith.constant 24 : index
    %117 = vector.load %arg20[%c0_49, %c24] : memref<16x32xf32, #tpu.memory_space<vmem>>, vector<8x8xf32>
    tpu.vector_store %arg20[%c0_49, %c24], %116 {strides = array<i32>} : memref<16x32xf32, #tpu.memory_space<vmem>>, vector<8x8xf32>,
    %c1 = arith.constant 1 : index
    %c0_50 = arith.constant 0 : index
    %c0_51 = arith.constant 0 : index
    %118 = vector.load %arg2[%c1, %c0_50, %c0_51] : memref<2x1x8xf32, #tpu.memory_space<vmem>>, vector<1x1x8xf32>
    %119 = vector.shape_cast %118 : vector<1x1x8xf32> to vector<1x8xf32>
    %120 = vector.extract_strided_slice %43 {offsets = [8, 0], sizes = [8, 8], strides = [1, 1]} : vector<16x32xf32> to vector<8x8xf32>
    %121 = vector.extract_strided_slice %36 {offsets = [8, 0], sizes = [8, 8], strides = [1, 1]} : vector<16x32xf32> to vector<8x8xf32>
    %122 = vector.extract_strided_slice %41 {offsets = [8, 0], sizes = [8, 8], strides = [1, 1]} : vector<16x32xf32> to vector<8x8xf32>
    %cst_52 = arith.constant dense<0.000000e+00> : vector<8x8xf32>
    %123 = tpu.matmul %120, %121, %cst_52 {dimension_numbers = #tpu.dot_dimension_numbers<[1], [1], [0], [0], [0, 0, 1, 0], [], []>} : vector<8x8xf32>, vector<8x8xf32>, vector<8x8xf32> -> vector<8x8xf32>
    %124 = vector.broadcast %119 : vector<1x8xf32> to vector<8x8xf32>
    %125 = arith.addf %123, %124 : vector<8x8xf32>
    %cst_53 = arith.constant dense<0xFF800000> : vector<8xf32>
    %126 = vector.multi_reduction <maximumf>, %125, %cst_53 [1] : vector<8x8xf32> to vector<8xf32>
    %127 = vector.shape_cast %126 : vector<8xf32> to vector<8x1xf32>
    %128 = vector.broadcast %127 : vector<8x1xf32> to vector<8x8xf32>
    %129 = arith.subf %125, %128 : vector<8x8xf32>
    %130 = math.exp %129 : vector<8x8xf32>
    %cst_54 = arith.constant dense<0.000000e+00> : vector<8xf32>
    %131 = vector.multi_reduction <add>, %130, %cst_54 [1] : vector<8x8xf32> to vector<8xf32>
    %132 = vector.shape_cast %131 : vector<8xf32> to vector<8x1xf32>
    %133 = tpu.reciprocal %132 {approx = true} : vector<8x1xf32> -> vector<8x1xf32>
    %134 = vector.broadcast %133 : vector<8x1xf32> to vector<8x8xf32>
    %135 = arith.mulf %130, %134 : vector<8x8xf32>
    %cst_55 = arith.constant dense<0.000000e+00> : vector<8x8xf32>
    %136 = tpu.matmul %135, %122, %cst_55 {dimension_numbers = #tpu.dot_dimension_numbers<[1], [0], [0], [1], [0, 0, 1, 1], [], []>} : vector<8x8xf32>, vector<8x8xf32>, vector<8x8xf32> -> vector<8x8xf32>
    %c8_56 = arith.constant 8 : index
    %c0_57 = arith.constant 0 : index
    %137 = vector.load %arg20[%c8_56, %c0_57] : memref<16x32xf32, #tpu.memory_space<vmem>>, vector<8x8xf32>
    tpu.vector_store %arg20[%c8_56, %c0_57], %136 {strides = array<i32>} : memref<16x32xf32, #tpu.memory_space<vmem>>, vector<8x8xf32>,
    %138 = vector.extract_strided_slice %43 {offsets = [8, 8], sizes = [8, 8], strides = [1, 1]} : vector<16x32xf32> to vector<8x8xf32>
    %139 = vector.extract_strided_slice %36 {offsets = [8, 8], sizes = [8, 8], strides = [1, 1]} : vector<16x32xf32> to vector<8x8xf32>
    %140 = vector.extract_strided_slice %41 {offsets = [8, 8], sizes = [8, 8], strides = [1, 1]} : vector<16x32xf32> to vector<8x8xf32>
    %cst_58 = arith.constant dense<0.000000e+00> : vector<8x8xf32>
    %141 = tpu.matmul %138, %139, %cst_58 {dimension_numbers = #tpu.dot_dimension_numbers<[1], [1], [0], [0], [0, 0, 1, 0], [], []>} : vector<8x8xf32>, vector<8x8xf32>, vector<8x8xf32> -> vector<8x8xf32>
    %142 = vector.broadcast %119 : vector<1x8xf32> to vector<8x8xf32>
    %143 = arith.addf %141, %142 : vector<8x8xf32>
    %cst_59 = arith.constant dense<0xFF800000> : vector<8xf32>
    %144 = vector.multi_reduction <maximumf>, %143, %cst_59 [1] : vector<8x8xf32> to vector<8xf32>
    %145 = vector.shape_cast %144 : vector<8xf32> to vector<8x1xf32>
    %146 = vector.broadcast %145 : vector<8x1xf32> to vector<8x8xf32>
    %147 = arith.subf %143, %146 : vector<8x8xf32>
    %148 = math.exp %147 : vector<8x8xf32>
    %cst_60 = arith.constant dense<0.000000e+00> : vector<8xf32>
    %149 = vector.multi_reduction <add>, %148, %cst_60 [1] : vector<8x8xf32> to vector<8xf32>
    %150 = vector.shape_cast %149 : vector<8xf32> to vector<8x1xf32>
    %151 = tpu.reciprocal %150 {approx = true} : vector<8x1xf32> -> vector<8x1xf32>
    %152 = vector.broadcast %151 : vector<8x1xf32> to vector<8x8xf32>
    %153 = arith.mulf %148, %152 : vector<8x8xf32>
    %cst_61 = arith.constant dense<0.000000e+00> : vector<8x8xf32>
    %154 = tpu.matmul %153, %140, %cst_61 {dimension_numbers = #tpu.dot_dimension_numbers<[1], [0], [0], [1], [0, 0, 1, 1], [], []>} : vector<8x8xf32>, vector<8x8xf32>, vector<8x8xf32> -> vector<8x8xf32>
    %c8_62 = arith.constant 8 : index
    %c8_63 = arith.constant 8 : index
    %155 = vector.load %arg20[%c8_62, %c8_63] : memref<16x32xf32, #tpu.memory_space<vmem>>, vector<8x8xf32>
    tpu.vector_store %arg20[%c8_62, %c8_63], %154 {strides = array<i32>} : memref<16x32xf32, #tpu.memory_space<vmem>>, vector<8x8xf32>,
    %156 = vector.extract_strided_slice %43 {offsets = [8, 16], sizes = [8, 8], strides = [1, 1]} : vector<16x32xf32> to vector<8x8xf32>
    %157 = vector.extract_strided_slice %36 {offsets = [8, 16], sizes = [8, 8], strides = [1, 1]} : vector<16x32xf32> to vector<8x8xf32>
    %158 = vector.extract_strided_slice %41 {offsets = [8, 16], sizes = [8, 8], strides = [1, 1]} : vector<16x32xf32> to vector<8x8xf32>
    %cst_64 = arith.constant dense<0.000000e+00> : vector<8x8xf32>
    %159 = tpu.matmul %156, %157, %cst_64 {dimension_numbers = #tpu.dot_dimension_numbers<[1], [1], [0], [0], [0, 0, 1, 0], [], []>} : vector<8x8xf32>, vector<8x8xf32>, vector<8x8xf32> -> vector<8x8xf32>
    %160 = vector.broadcast %119 : vector<1x8xf32> to vector<8x8xf32>
    %161 = arith.addf %159, %160 : vector<8x8xf32>
    %cst_65 = arith.constant dense<0xFF800000> : vector<8xf32>
    %162 = vector.multi_reduction <maximumf>, %161, %cst_65 [1] : vector<8x8xf32> to vector<8xf32>
    %163 = vector.shape_cast %162 : vector<8xf32> to vector<8x1xf32>
    %164 = vector.broadcast %163 : vector<8x1xf32> to vector<8x8xf32>
    %165 = arith.subf %161, %164 : vector<8x8xf32>
    %166 = math.exp %165 : vector<8x8xf32>
    %cst_66 = arith.constant dense<0.000000e+00> : vector<8xf32>
    %167 = vector.multi_reduction <add>, %166, %cst_66 [1] : vector<8x8xf32> to vector<8xf32>
    %168 = vector.shape_cast %167 : vector<8xf32> to vector<8x1xf32>
    %169 = tpu.reciprocal %168 {approx = true} : vector<8x1xf32> -> vector<8x1xf32>
    %170 = vector.broadcast %169 : vector<8x1xf32> to vector<8x8xf32>
    %171 = arith.mulf %166, %170 : vector<8x8xf32>
    %cst_67 = arith.constant dense<0.000000e+00> : vector<8x8xf32>
    %172 = tpu.matmul %171, %158, %cst_67 {dimension_numbers = #tpu.dot_dimension_numbers<[1], [0], [0], [1], [0, 0, 1, 1], [], []>} : vector<8x8xf32>, vector<8x8xf32>, vector<8x8xf32> -> vector<8x8xf32>
    %c8_68 = arith.constant 8 : index
    %c16_69 = arith.constant 16 : index
    %173 = vector.load %arg20[%c8_68, %c16_69] : memref<16x32xf32, #tpu.memory_space<vmem>>, vector<8x8xf32>
    tpu.vector_store %arg20[%c8_68, %c16_69], %172 {strides = array<i32>} : memref<16x32xf32, #tpu.memory_space<vmem>>, vector<8x8xf32>,
    %174 = vector.extract_strided_slice %43 {offsets = [8, 24], sizes = [8, 8], strides = [1, 1]} : vector<16x32xf32> to vector<8x8xf32>
    %175 = vector.extract_strided_slice %36 {offsets = [8, 24], sizes = [8, 8], strides = [1, 1]} : vector<16x32xf32> to vector<8x8xf32>
    %176 = vector.extract_strided_slice %41 {offsets = [8, 24], sizes = [8, 8], strides = [1, 1]} : vector<16x32xf32> to vector<8x8xf32>
    %cst_70 = arith.constant dense<0.000000e+00> : vector<8x8xf32>
    %177 = tpu.matmul %174, %175, %cst_70 {dimension_numbers = #tpu.dot_dimension_numbers<[1], [1], [0], [0], [0, 0, 1, 0], [], []>} : vector<8x8xf32>, vector<8x8xf32>, vector<8x8xf32> -> vector<8x8xf32>
    %178 = vector.broadcast %119 : vector<1x8xf32> to vector<8x8xf32>
    %179 = arith.addf %177, %178 : vector<8x8xf32>
    %cst_71 = arith.constant dense<0xFF800000> : vector<8xf32>
    %180 = vector.multi_reduction <maximumf>, %179, %cst_71 [1] : vector<8x8xf32> to vector<8xf32>
    %181 = vector.shape_cast %180 : vector<8xf32> to vector<8x1xf32>
    %182 = vector.broadcast %181 : vector<8x1xf32> to vector<8x8xf32>
    %183 = arith.subf %179, %182 : vector<8x8xf32>
    %184 = math.exp %183 : vector<8x8xf32>
    %cst_72 = arith.constant dense<0.000000e+00> : vector<8xf32>
    %185 = vector.multi_reduction <add>, %184, %cst_72 [1] : vector<8x8xf32> to vector<8xf32>
    %186 = vector.shape_cast %185 : vector<8xf32> to vector<8x1xf32>
    %187 = tpu.reciprocal %186 {approx = true} : vector<8x1xf32> -> vector<8x1xf32>
    %188 = vector.broadcast %187 : vector<8x1xf32> to vector<8x8xf32>
    %189 = arith.mulf %184, %188 : vector<8x8xf32>
    %cst_73 = arith.constant dense<0.000000e+00> : vector<8x8xf32>
    %190 = tpu.matmul %189, %176, %cst_73 {dimension_numbers = #tpu.dot_dimension_numbers<[1], [0], [0], [1], [0, 0, 1, 1], [], []>} : vector<8x8xf32>, vector<8x8xf32>, vector<8x8xf32> -> vector<8x8xf32>
    %c8_74 = arith.constant 8 : index
    %c24_75 = arith.constant 24 : index
    %191 = vector.load %arg20[%c8_74, %c24_75] : memref<16x32xf32, #tpu.memory_space<vmem>>, vector<8x8xf32>
    tpu.vector_store %arg20[%c8_74, %c24_75], %190 {strides = array<i32>} : memref<16x32xf32, #tpu.memory_space<vmem>>, vector<8x8xf32>,
    %c0_76 = arith.constant 0 : index
    %c0_77 = arith.constant 0 : index
    %192 = vector.load %arg20[%c0_76, %c0_77] : memref<16x32xf32, #tpu.memory_space<vmem>>, vector<16x32xf32>
    %193 = arith.truncf %192 : vector<16x32xf32> to vector<16x32xbf16>
    %c0_78 = arith.constant 0 : index
    %c0_79 = arith.constant 0 : index
    %194 = vector.load %arg11[%c0_78, %c0_79] : memref<32x32xbf16, #tpu.memory_space<vmem>>, vector<32x32xbf16>
    %cst_80 = arith.constant dense<0.000000e+00> : vector<16x32xf32>
    %195 = tpu.matmul %193, %194, %cst_80 {dimension_numbers = #tpu.dot_dimension_numbers<[1], [0], [0], [1], [0, 0, 1, 1], [], []>} : vector<16x32xbf16>, vector<32x32xbf16>, vector<16x32xf32> -> vector<16x32xf32>
    %c0_81 = arith.constant 0 : index
    %c0_82 = arith.constant 0 : index
    %196 = vector.load %arg12[%c0_81, %c0_82] : memref<1x32xf32, #tpu.memory_space<vmem>>, vector<1x32xf32>
    %197 = vector.broadcast %196 : vector<1x32xf32> to vector<16x32xf32>
    %198 = arith.addf %195, %197 : vector<16x32xf32>
    %199 = arith.addf %1, %198 : vector<16x32xf32>
    %c0_83 = arith.constant 0 : index
    %c0_84 = arith.constant 0 : index
    %200 = vector.load %arg13[%c0_83, %c0_84] : memref<1x32xf32, #tpu.memory_space<vmem>>, vector<1x32xf32>
    %c0_85 = arith.constant 0 : index
    %c0_86 = arith.constant 0 : index
    %201 = vector.load %arg14[%c0_85, %c0_86] : memref<1x32xf32, #tpu.memory_space<vmem>>, vector<1x32xf32>
    %cst_87 = arith.constant dense<0.000000e+00> : vector<16xf32>
    %202 = vector.multi_reduction <add>, %199, %cst_87 [1] : vector<16x32xf32> to vector<16xf32>
    %203 = vector.shape_cast %202 : vector<16xf32> to vector<16x1xf32>
    %cst_88 = arith.constant 3.200000e+01 : f32
    %204 = vector.broadcast %cst_88 : f32 to vector<16x1xf32>
    %205 = arith.divf %203, %204 : vector<16x1xf32>
    %206 = vector.broadcast %205 : vector<16x1xf32> to vector<16x32xf32>
    %207 = arith.subf %199, %206 : vector<16x32xf32>
    %208 = arith.mulf %207, %207 : vector<16x32xf32>
    %cst_89 = arith.constant dense<0.000000e+00> : vector<16xf32>
    %209 = vector.multi_reduction <add>, %208, %cst_89 [1] : vector<16x32xf32> to vector<16xf32>
    %210 = vector.shape_cast %209 : vector<16xf32> to vector<16x1xf32>
    %cst_90 = arith.constant 3.200000e+01 : f32
    %211 = vector.broadcast %cst_90 : f32 to vector<16x1xf32>
    %212 = arith.divf %210, %211 : vector<16x1xf32>
    %213 = vector.broadcast %205 : vector<16x1xf32> to vector<16x32xf32>
    %214 = arith.subf %199, %213 : vector<16x32xf32>
    %cst_91 = arith.constant 9.99999974E-6 : f32
    %215 = vector.broadcast %cst_91 : f32 to vector<16x1xf32>
    %216 = arith.addf %212, %215 : vector<16x1xf32>
    %217 = math.rsqrt %216 : vector<16x1xf32>
    %218 = vector.broadcast %217 : vector<16x1xf32> to vector<16x32xf32>
    %219 = arith.mulf %214, %218 : vector<16x32xf32>
    %220 = vector.broadcast %200 : vector<1x32xf32> to vector<16x32xf32>
    %221 = arith.mulf %219, %220 : vector<16x32xf32>
    %222 = vector.broadcast %201 : vector<1x32xf32> to vector<16x32xf32>
    %223 = arith.addf %221, %222 : vector<16x32xf32>
    %224 = arith.truncf %223 : vector<16x32xf32> to vector<16x32xbf16>
    %cst_92 = arith.constant 0.000000e+00 : f32
    %225 = vector.broadcast %cst_92 : f32 to vector<16x32xf32>
    %c0_93 = arith.constant 0 : index
    %c0_94 = arith.constant 0 : index
    %226 = vector.load %arg15[%c0_93, %c0_94] : memref<32x64xbf16, #tpu.memory_space<vmem>>, vector<32x64xbf16>
    %cst_95 = arith.constant dense<0.000000e+00> : vector<16x64xf32>
    %227 = tpu.matmul %224, %226, %cst_95 {dimension_numbers = #tpu.dot_dimension_numbers<[1], [0], [0], [1], [0, 0, 1, 1], [], []>} : vector<16x32xbf16>, vector<32x64xbf16>, vector<16x64xf32> -> vector<16x64xf32>
    %c0_96 = arith.constant 0 : index
    %c0_97 = arith.constant 0 : index
    %228 = vector.load %arg16[%c0_96, %c0_97] : memref<1x64xf32, #tpu.memory_space<vmem>>, vector<1x64xf32>
    %229 = vector.broadcast %228 : vector<1x64xf32> to vector<16x64xf32>
    %230 = arith.addf %227, %229 : vector<16x64xf32>
    %cst_98 = arith.constant 0.000000e+00 : f32
    %231 = vector.broadcast %cst_98 : f32 to vector<16x64xf32>
    %232 = arith.maximumf %230, %231 : vector<16x64xf32>
    %233 = arith.truncf %232 : vector<16x64xf32> to vector<16x64xbf16>
    %c0_99 = arith.constant 0 : index
    %c0_100 = arith.constant 0 : index
    %234 = vector.load %arg17[%c0_99, %c0_100] : memref<64x32xbf16, #tpu.memory_space<vmem>>, vector<64x32xbf16>
    %cst_101 = arith.constant dense<0.000000e+00> : vector<16x32xf32>
    %235 = tpu.matmul %233, %234, %cst_101 {dimension_numbers = #tpu.dot_dimension_numbers<[1], [0], [0], [1], [0, 0, 1, 1], [], []>} : vector<16x64xbf16>, vector<64x32xbf16>, vector<16x32xf32> -> vector<16x32xf32>
    %236 = arith.addf %225, %235 : vector<16x32xf32>
    %c0_102 = arith.constant 0 : index
    %c0_103 = arith.constant 0 : index
    %237 = vector.load %arg18[%c0_102, %c0_103] : memref<1x32xf32, #tpu.memory_space<vmem>>, vector<1x32xf32>
    %238 = vector.broadcast %237 : vector<1x32xf32> to vector<16x32xf32>
    %239 = arith.addf %236, %238 : vector<16x32xf32>
    %240 = arith.addf %199, %239 : vector<16x32xf32>
    %241 = vector.shape_cast %240 : vector<16x32xf32> to vector<2x8x32xf32>
    %c0_104 = arith.constant 0 : index
    %c0_105 = arith.constant 0 : index
    %c0_106 = arith.constant 0 : index
    %242 = vector.load %arg19[%c0_104, %c0_105, %c0_106] : memref<2x8x32xf32, #tpu.memory_space<vmem>>, vector<2x8x32xf32>
    tpu.vector_store %arg19[%c0_104, %c0_105, %c0_106], %241 {strides = array<i32>} : memref<2x8x32xf32, #tpu.memory_space<vmem>>, vector<2x8x32xf32>,
    return
  }
  func.func @transform_0(%arg0: i32) -> (i32, i32, i32) {
    %c0_i32 = arith.constant 0 : i32
    %c0_i32_0 = arith.constant 0 : i32
    %c0_i32_1 = arith.constant 0 : i32
    return %arg0, %c0_i32, %c0_i32_0 : i32, i32, i32
  }
  func.func @transform_1(%arg0: i32) -> (i32, i32, i32) {
    %c0_i32 = arith.constant 0 : i32
    %c0_i32_0 = arith.constant 0 : i32
    %c0_i32_1 = arith.constant 0 : i32
    return %arg0, %c0_i32, %c0_i32_0 : i32, i32, i32
  }
  func.func @transform_2(%arg0: i32) -> (i32, i32) {
    %c0_i32 = arith.constant 0 : i32
    %c0_i32_0 = arith.constant 0 : i32
    %c0_i32_1 = arith.constant 0 : i32
    return %c0_i32, %c0_i32_0 : i32, i32
  }
  func.func @transform_3(%arg0: i32) -> (i32, i32) {
    %c0_i32 = arith.constant 0 : i32
    %c0_i32_0 = arith.constant 0 : i32
    %c0_i32_1 = arith.constant 0 : i32
    return %c0_i32, %c0_i32_0 : i32, i32
  }
  func.func @transform_4(%arg0: i32) -> (i32, i32) {
    %c0_i32 = arith.constant 0 : i32
    %c0_i32_0 = arith.constant 0 : i32
    %c0_i32_1 = arith.constant 0 : i32
    return %c0_i32, %c0_i32_0 : i32, i32
  }
  func.func @transform_5(%arg0: i32) -> (i32, i32) {
    %c0_i32 = arith.constant 0 : i32
    %c0_i32_0 = arith.constant 0 : i32
    %c0_i32_1 = arith.constant 0 : i32
    return %c0_i32, %c0_i32_0 : i32, i32
  }
  func.func @transform_6(%arg0: i32) -> (i32, i32) {
    %c0_i32 = arith.constant 0 : i32
    %c0_i32_0 = arith.constant 0 : i32
    %c0_i32_1 = arith.constant 0 : i32
    return %c0_i32, %c0_i32_0 : i32, i32
  }
  func.func @transform_7(%arg0: i32) -> (i32, i32) {
    %c0_i32 = arith.constant 0 : i32
    %c0_i32_0 = arith.constant 0 : i32
    %c0_i32_1 = arith.constant 0 : i32
    return %c0_i32, %c0_i32_0 : i32, i32
  }
  func.func @transform_8(%arg0: i32) -> (i32, i32) {
    %c0_i32 = arith.constant 0 : i32
    %c0_i32_0 = arith.constant 0 : i32
    %c0_i32_1 = arith.constant 0 : i32
    return %c0_i32, %c0_i32_0 : i32, i32
  }
  func.func @transform_9(%arg0: i32) -> (i32, i32) {
    %c0_i32 = arith.constant 0 : i32
    %c0_i32_0 = arith.constant 0 : i32
    %c0_i32_1 = arith.constant 0 : i32
    return %c0_i32, %c0_i32_0 : i32, i32
  }
  func.func @transform_10(%arg0: i32) -> (i32, i32) {
    %c0_i32 = arith.constant 0 : i32
    %c0_i32_0 = arith.constant 0 : i32
    %c0_i32_1 = arith.constant 0 : i32
    return %c0_i32, %c0_i32_0 : i32, i32
  }
  func.func @transform_11(%arg0: i32) -> (i32, i32) {
    %c0_i32 = arith.constant 0 : i32
    %c0_i32_0 = arith.constant 0 : i32
    %c0_i32_1 = arith.constant 0 : i32
    return %c0_i32, %c0_i32_0 : i32, i32
  }
  func.func @transform_12(%arg0: i32) -> (i32, i32) {
    %c0_i32 = arith.constant 0 : i32
    %c0_i32_0 = arith.constant 0 : i32
    %c0_i32_1 = arith.constant 0 : i32
    return %c0_i32, %c0_i32_0 : i32, i32
  }
  func.func @transform_13(%arg0: i32) -> (i32, i32) {
    %c0_i32 = arith.constant 0 : i32
    %c0_i32_0 = arith.constant 0 : i32
    %c0_i32_1 = arith.constant 0 : i32
    return %c0_i32, %c0_i32_0 : i32, i32
  }
  func.func @transform_14(%arg0: i32) -> (i32, i32) {
    %c0_i32 = arith.constant 0 : i32
    %c0_i32_0 = arith.constant 0 : i32
    %c0_i32_1 = arith.constant 0 : i32
    return %c0_i32, %c0_i32_0 : i32, i32
  }
  func.func @transform_15(%arg0: i32) -> (i32, i32) {
    %c0_i32 = arith.constant 0 : i32
    %c0_i32_0 = arith.constant 0 : i32
    %c0_i32_1 = arith.constant 0 : i32
    return %c0_i32, %c0_i32_0 : i32, i32
  }
  func.func @transform_16(%arg0: i32) -> (i32, i32) {
    %c0_i32 = arith.constant 0 : i32
    %c0_i32_0 = arith.constant 0 : i32
    %c0_i32_1 = arith.constant 0 : i32
    return %c0_i32, %c0_i32_0 : i32, i32
  }
  func.func @transform_17(%arg0: i32) -> (i32, i32) {
    %c0_i32 = arith.constant 0 : i32
    %c0_i32_0 = arith.constant 0 : i32
    %c0_i32_1 = arith.constant 0 : i32
    return %c0_i32, %c0_i32_0 : i32, i32
  }
  func.func @transform_18(%arg0: i32) -> (i32, i32, i32) {
    %c0_i32 = arith.constant 0 : i32
    %c0_i32_0 = arith.constant 0 : i32
    %c0_i32_1 = arith.constant 0 : i32
    return %arg0, %c0_i32, %c0_i32_0 : i32, i32, i32
  }
}

</mosaic_0001>

<bundles_post_ra>
// kernel: tpu_custom_call.1
= control target key start
LH: loop header
LB: loop body
LE: loop exit
PB: predicated region body
PF: predicated region fallthrough
CT: control target
= control target key end

     0   :  { %s1703_s0 = inlined_call_operand.vmem [shape: f32[2,8,32], index: 0, kind: input, shape index: {}]   ;;  %s1704_s1 = inlined_call_operand.hbm [shape: f32[2,1,8], index: 1, kind: input, shape index: {}]   ;;  %s1705_s2 = inlined_call_operand.vmem [shape: f32[1,32], index: 2, kind: input, shape index: {}]   ;;  %s1706_s3 = inlined_call_operand.vmem [shape: f32[1,32], index: 3, kind: input, shape index: {}]   ;;  %s1707_s4 = inlined_call_operand.vmem [shape: bf16[32,32], index: 4, kind: input, shape index: {}]   ;;  %s1708_s5 = inlined_call_operand.vmem [shape: f32[1,32], index: 5, kind: input, shape index: {}]   ;;  %s1709_s6 = inlined_call_operand.vmem [shape: bf16[32,32], index: 6, kind: input, shape index: {}]   ;;  %s1710_s7 = inlined_call_operand.vmem [shape: f32[1,32], index: 7, kind: input, shape index: {}]   ;;  %s1711_s8 = inlined_call_operand.hbm [shape: bf16[32,32], index: 8, kind: input, shape index: {}]   ;;  %s1712_s9 = inlined_call_operand.vmem [shape: f32[1,32], index: 9, kind: input, shape index: {}]   ;;  %s1713_s10 = inlined_call_operand.hbm [shape: bf16[32,32], index: 10, kind: input, shape index: {}]   ;;  %s1714_s11 = inlined_call_operand.vmem [shape: f32[1,32], index: 11, kind: input, shape index: {}]   ;;  %s1715_s12 = inlined_call_operand.vmem [shape: f32[1,32], index: 12, kind: input, shape index: {}]   ;;  %s1716_s13 = inlined_call_operand.vmem [shape: f32[1,32], index: 13, kind: input, shape index: {}]   ;;  %s1717_s14 = inlined_call_operand.hbm [shape: bf16[32,64], index: 14, kind: input, shape index: {}]   ;;  %s1718_s15 = inlined_call_operand.vmem [shape: f32[1,64], index: 15, kind: input, shape index: {}]   ;;  %s1719_s16 = inlined_call_operand.vmem [shape: bf16[64,32], index: 16, kind: input, shape index: {}]   ;;  %s1720_s17 = inlined_call_operand.vmem [shape: f32[1,32], index: 17, kind: input, shape index: {}]   ;;  %s1721_s18 = inlined_call_operand.hbm [shape: f32[2,8,32], index: 18, kind: output, shape index: {}]  }
   0x1   :  { %1723 = sst [smem:[#allocation16_spill]] %s1703_s0 }
   0x2   :  { %1724 = sst [smem:[#allocation17_spill]] %s1704_s1 }
   0x3   :  { %1725 = sst [smem:[#allocation18_spill]] %s1705_s2 }
   0x4   :  { %23 = vsyncpa [#allocation4], 0 }
   0x5   :  { %24 = vsyncpa [#allocation7], 0 }
   0x6   :  { %25 = vsyncpa [#allocation10], 0  ;;  %s58_s29 = sshll.u32 %s1711_s8, 4  ;;  %s59_s29 = int_to_ptr.hbm [resolvable:$true] %s58_s29 }
   0x7   :  { %26 = vsyncpa [#allocation5], 0  ;;  %s1371_s30 = smov [#allocation6]   ;;  %s1726_s20 = sld [smem:[#allocation17_spill]] }
   0x8   :  { %s60_s0 = sshll.u32 %s1371_s30, 4  ;;  %s1372_s22 = smov 64   ;;  %s61_s0 = int_to_ptr.vmem [resolvable:$true] %s60_s0 }
   0x9   :  { %s1373_s2 = smov 4   ;;  %s1374_s23 = smov [#allocation3]  }
   0xa   :  { %66 = dma.hbm_to_vmem [thread:$0]  %s59_s29, 256, %s61_s0, [#allocation7], %s1372_s22, %s1372_s22, %s1373_s2  }
   0xb   :  { %s35_s24 = sshll.u32 %s1374_s23, 4  ;;  %s1375_s25 = smov 16   ;;  %s36_s24 = int_to_ptr.vmem [resolvable:$true] %s35_s24 }
   0xc   :  { %s1376_s26 = smov 1   ;;  %s73_s28 = sshll.u32 %s1713_s10, 4  ;;  %s74_s28 = int_to_ptr.hbm [resolvable:$true] %s73_s28 }
   0xd   :  { %s33_s21 = sshll.u32 %s1726_s20, 4  ;;  %s1377_s30 = smov [#allocation8]   ;;  %s34_s21 = int_to_ptr.hbm [resolvable:$true] %s33_s21 }
   0xe   :  { %41 = dma.hbm_to_vmem [thread:$0]  %s34_s21, 32, %s36_s24, [#allocation4], %s1375_s25, %s1375_s25, %s1376_s26  }
   0xf   :  { %s75_s19 = sshll.u32 %s1377_s30, 4  ;;  %s92_s29 = sshll.u32 %s1717_s14, 4  ;;  %s76_s19 = int_to_ptr.vmem [resolvable:$true] %s75_s19  ;;  %s93_s29 = int_to_ptr.hbm [resolvable:$true] %s92_s29 }
  0x10   :  { %81 = dma.hbm_to_vmem [thread:$0]  %s74_s28, 256, %s76_s19, [#allocation7], %s1372_s22, %s1372_s22, %s1373_s2  }
  0x11   :  { %s1378_s0 = smov [#allocation9]  }
  0x12   :  { %s94_s23 = sshll.u32 %s1378_s0, 4  ;;  %s95_s23 = int_to_ptr.vmem [resolvable:$true] %s94_s23 }
  0x13   :  { %100 = dma.hbm_to_vmem [thread:$0]  %s93_s29, 256, %s95_s23, [#allocation10], %s1372_s22, %s1372_s22, %s1373_s2  }
  0x14   :  { %1363 = dma.done.wait [#allocation4], 32  }
  0x15   :  { %1364 = vsyncadd [#allocation4], 4294967264 }
  0x16   :  { %1365 = dma.done.wait [#allocation7], 512  }
  0x17   :  { %1366 = vsyncadd [#allocation7], 4294966784 }
  0x18   :  { %1367 = dma.done.wait [#allocation10], 256  }
  0x19   :  { %1368 = vsyncadd [#allocation10], 4294967040  ;;  %vm128_vm0 = vcmask 261120   ;;  %s1727_s24 = sld [smem:[#allocation16_spill]]  ;;  %v1379_v4 = vmov 32.0   ;;  %v1160_v21 = vld [vmem:[%s1707_s4 + $0x8] sm:$0xff] }
  0x1a   :  { %1201 = vrcp.f32 %v1379_v4  ;;  %v1162_v22 = vld [vmem:[%s1709_s6 + $0x8] sm:$0xff]  ;;  %v1164_v23 = vld [vmem:[#allocation6 + $0x8] sm:$0xff]  ;;  %220 = vmatpush.bf16.msra.mxu0 %v1160_v21  ;;  %v1163_v28 = vld [vmem:[#allocation6] sm:$0xff]  ;;  %s1728_s20 = sld [smem:[#allocation18_spill]]  ;;  %vm302_vm8 = vcmask 64512   ;;  %s1381_s14 = smov 120  }
  0x1b   :  { %254 = vmatpush.bf16.msra.mxu1 %v1162_v22  ;;  %v1159_v25 = vld [vmem:[%s1707_s4] sm:$0xff]  ;;  %288 = vmatpush.bf16.msra.mxu2 %v1164_v23  ;;  %v1579_v21 = vld [vmem:[#allocation3 + $0x1] ss:$0 sm:$0xff]  ;;  %s1384_s22 = smov 24   ;;  %vm434_vm9 = vcmask 130112   ;;  %vm505_vm10 = vcmask 195712  }
  0x1c   :  { %v1161_v26 = vld [vmem:[%s1709_s6] sm:$0xff]  ;;  %vm576_vm11 = vcmask 261312  }
  0x1d   :  { %v1190_v51 = vld [vmem:[%s1706_s3] ss:$0 sm:$0xff]  ;;  %s1380_s3 = smov 112  }
  0x1e   :  { %221 = vmatpush.bf16.msra.mxu0 %v1159_v25  ;;  %v1191_v56 = vld [vmem:[%s1708_s5] ss:$0 sm:$0xff] }
  0x1f   :  { %v1499_v0 = vld [vmem:[%s1727_s24] sm:$0xff]  ;;  %v1506_v2 = vld [vmem:[%s1727_s24 + $0x8] sm:$0xff]  ;;  %255 = vmatpush.bf16.msra.mxu1 %v1161_v26  ;;  %289 = vmatpush.bf16.msra.mxu2 %v1163_v28 }
  0x20   :  { %v129_v1 = vsel %vm128_vm0, %v1499_v0, 0.0  ;;  %v132_v3 = vsel %vm128_vm0, %v1506_v2, 0.0  ;;  %v1202_v5 = vpop.eup %1201  ;;  %v1189_v46 = vld [vmem:[%s1728_s20] ss:$0 sm:$0xff] }
  0x21   :  { %130 = vadd.xlane.f32.xlu0 %v129_v1  ;;  %v136_v6 = vmul.f32 32.0, %v1202_v5  ;;  %vm140_vm1 = vweird.f32 %v1202_v5  ;;  %v1192_v57 = vld [vmem:[%s1710_s7] ss:$0 sm:$0xff]  ;;  %s1382_s7 = smov 104  }
  0x22   :  { %v1553_v63 = vld [vmem:[%s1712_s9] ss:$0 sm:$0xff]  ;;  %s1383_s9 = smov 8  }
  0x23   :  { %v137_v7 = vsub.f32 1.0, %v136_v6 }
  0x25   :  { %v138_v8 = vmul.f32 %v1202_v5, %v137_v7 }
  0x27   :  { %v139_v9 = vadd.f32 %v1202_v5, %v138_v8 }
  0x29   :  { %133 = vadd.xlane.f32.xlu0 %v132_v3  ;;  %v1510_v10 = vsel %vm140_vm1, %v1202_v5, %v139_v9 }
  0x94   :  { %v131_v11 = vpop.xlane.xlu0 %130 }
  0x95   :  { %v142_v12 = vmul.f32 %v1510_v10, %v131_v11 }
  0x97   :  { %v144_v13 = vsub.f32 %v1499_v0, %v142_v12 }
  0x99   :  { %v146_v14 = vmul.f32 %v144_v13, %v144_v13 }
  0x9b   :  { %v148_v15 = vsel %vm128_vm0, %v146_v14, 0.0 }
  0x9c   :  { %149 = vadd.xlane.f32.xlu1 %v148_v15  ;;  %v134_v16 = vpop.xlane.xlu0 %133  ;;  %v1573_v15 = vld [vmem:[#allocation3] ss:$0 sm:$0xff] }
  0x9d   :  { %v143_v17 = vmul.f32 %v1510_v10, %v134_v16 }
  0x9f   :  { %v145_v18 = vsub.f32 %v1506_v2, %v143_v17 }
  0xa1   :  { %v147_v19 = vmul.f32 %v145_v18, %v145_v18 }
  0xa3   :  { %v151_v20 = vsel %vm128_vm0, %v147_v19, 0.0 }
  0xa4   :  { %152 = vadd.xlane.f32.xlu1 %v151_v20 }
 0x10f   :  { %v150_v24 = vpop.xlane.xlu1 %149 }
 0x110   :  { %v154_v27 = vmul.f32 %v150_v24, %v1510_v10 }
 0x112   :  { %v156_v29 = vadd.f32 1e-05, %v154_v27 }
 0x114   :  { %1203 = vrsqrt.f32 %v156_v29  ;;  %vm164_vm3 = vweird.f32 %v156_v29 }
 0x117   :  { %v153_v30 = vpop.xlane.xlu1 %152 }
 0x118   :  { %v155_v31 = vmul.f32 %v153_v30, %v1510_v10 }
 0x11a   :  { %v1204_v32 = vpop.eup %1203  ;;  %v157_v33 = vadd.f32 1e-05, %v155_v31 }
 0x11b   :  { %v159_v34 = vmul.f32 %v1204_v32, %v156_v29  ;;  %vm165_vm2 = vweird.f32 %v1204_v32 }
 0x11c   :  { %1205 = vrsqrt.f32 %v157_v33  ;;  %vm166_vm4 = vmor %vm164_vm3, %vm165_vm2  ;;  %vm174_vm6 = vweird.f32 %v157_v33  ;;  %vm1030_vm3 = vcmask 523264  }
 0x11d   :  { %v160_v35 = vmul.f32 %v1204_v32, %v159_v34 }
 0x11f   :  { %v161_v36 = vmul.f32 0.5, %v160_v35 }
 0x121   :  { %v162_v37 = vsub.f32 1.5, %v161_v36 }
 0x122   :  { %v1206_v38 = vpop.eup %1205 }
 0x123   :  { %v163_v39 = vmul.f32 %v1204_v32, %v162_v37  ;;  %v169_v40 = vmul.f32 %v1206_v38, %v157_v33  ;;  %vm175_vm5 = vweird.f32 %v1206_v38 }
 0x124   :  { %vm176_vm7 = vmor %vm174_vm6, %vm175_vm5 }
 0x125   :  { %v170_v41 = vmul.f32 %v1206_v38, %v169_v40  ;;  %v167_v42 = vsel %vm166_vm4, %v1204_v32, %v163_v39 }
 0x126   :  { %v178_v45 = vmul.f32 %v167_v42, %v144_v13 }
 0x127   :  { %v171_v43 = vmul.f32 0.5, %v170_v41 }
 0x128   :  { %v183_v50 = vmul.f32 %v1189_v46, %v178_v45 }
 0x129   :  { %v172_v44 = vsub.f32 1.5, %v171_v43 }
 0x12a   :  { %v188_v53 = vadd.f32 %v1190_v51, %v183_v50 }
 0x12b   :  { %v173_v47 = vmul.f32 %v1206_v38, %v172_v44 }
 0x12d   :  { %v177_v48 = vsel %vm176_vm7, %v1206_v38, %v173_v47 }
 0x12e   :  { %v179_v49 = vmul.f32 %v177_v48, %v145_v18 }
 0x130   :  { %v184_v52 = vmul.f32 %v1189_v46, %v179_v49 }
 0x132   :  { %v189_v54 = vadd.f32 %v1190_v51, %v184_v52 }
 0x134   :  { %v190_v55 = vpack.c.bf16 %v189_v54, %v188_v53 }
 0x136   :  { %1081 = vmatmul.msk.bf16.vlgmr.msra.gmra.mxu0 %vm128_vm0, %v190_v55  ;;  %1090 = vmatmul.msk.bf16.vlgmr.msra.gmra.mxu1 %vm128_vm0, %v190_v55 }
 0x137   :  { %1099 = vmatmul.msk.bf16.vlgmr.msra.gmra.mxu2 %vm128_vm0, %v190_v55 }
 0x1b3   :  { %v223_v58 = vpop.f32.mrf.mxu0  ;;  %v257_v59 = vpop.f32.mrf.mxu1 }
 0x1b4   :  { %v224_v60 = vadd.f32 %v1191_v56, %v223_v58  ;;  %v258_v61 = vadd.f32 %v1192_v57, %v257_v59 }
 0x1b6   :  { %v296_v62 = vmul.f32 0.35355338, %v224_v60  ;;  %438 = vrot.lane.b32.xlu2 %v258_v61, %s1380_s3  ;;  %366 = vrot.lane.b32.xlu0 %v258_v61, %s1381_s14 }
 0x1b7   :  { %1100 = vmatpush.xpose.msk.msrb.mxu0 %vm302_vm8, %v258_v61 }
 0x1b8   :  { %364 = vrot.lane.b32.xlu1 %v296_v62, %s1381_s14 }
 0x1ba   :  { %v291_v1 = vpop.f32.mrf.mxu2  ;;  %1101 = vmatmul.msk.f32.vlgmr.msrb.gmra.mxu0 %vm302_vm8, %v296_v62 }
 0x1bb   :  { %v1558_v3 = vadd.f32 %v1553_v63, %v291_v1  ;;  %v259_v4 = vpop.f32.mrf.mxu1  ;;  %v225_v6 = vpop.f32.mrf.mxu0 }
 0x1bc   :  { %v260_v5 = vadd.f32 %v1192_v57, %v259_v4  ;;  %v226_v7 = vadd.f32 %v1191_v56, %v225_v6 }
 0x1bd   :  { %358 = vmatpush.msra.mxu3 %v1558_v3 }
 0x1be   :  { %509 = vrot.lane.b32.xlu0 %v258_v61, %s1382_s7  ;;  %436 = vrot.lane.b32.xlu2 %v296_v62, %s1380_s3  ;;  %v297_v8 = vmul.f32 0.35355338, %v226_v7 }
 0x1c0   :  { %507 = vrot.lane.b32.xlu1 %v296_v62, %s1382_s7 }
 0x1c6   :  { %646 = vrot.lane.b32.xlu0 %v260_v5, %s1381_s14 }
 0x1c8   :  { %717 = vrot.lane.b32.xlu1 %v260_v5, %s1380_s3 }
 0x1ce   :  { %787 = vrot.lane.b32.xlu0 %v260_v5, %s1382_s7 }
 0x1d0   :  { %785 = vrot.lane.b32.xlu1 %v297_v8, %s1382_s7 }
 0x210   :  { %v439_v9 = vpop.permute.xlu2 %438 }
 0x211   :  { %1106 = vmatpush.xpose.msk.msrb.mxu1 %vm302_vm8, %v439_v9 }
 0x215   :  { %1112 = vmatpush.xpose.msk.msra.mxu1 %vm302_vm8, %v260_v5 }
 0x218   :  { %v437_v11 = vpop.permute.xlu2 %436 }
 0x219   :  { %1107 = vmatmul.msk.f32.vlgmr.msrb.gmra.mxu1 %vm302_vm8, %v437_v11 }
 0x221   :  { %1113 = vmatmul.msk.f32.vlgmr.msra.gmra.mxu1 %vm302_vm8, %v297_v8 }
 0x228   :  { %v367_v12 = vpop.permute.xlu0 %366 }
 0x229   :  { %1103 = vmatpush.xpose.msk.msrb.mxu3 %vm302_vm8, %v367_v12 }
 0x22a   :  { %v365_v13 = vpop.permute.xlu1 %364 }
 0x230   :  { %v510_v34 = vpop.permute.xlu0 %509 }
 0x232   :  { %v508_v14 = vpop.permute.xlu1 %507 }
 0x237   :  { %v326_v16 = vpop.f32.mrf.mxu0 }
 0x238   :  { %v327_v17 = vadd.f32 %v1573_v15, %v326_v16  ;;  %v647_v38 = vpop.permute.xlu0 %646 }
 0x23a   :  { %v718_v18 = vpop.permute.xlu1 %717  ;;  %v329_v19 = vsel %vm302_vm8, %v327_v17, -inf }
 0x23b   :  { %330 = vmax.xlane.f32.xlu2 %v329_v19  ;;  %1118 = vmatpush.xpose.msk.msrb.mxu1 %vm302_vm8, %v718_v18 }
 0x240   :  { %v788_v39 = vpop.permute.xlu0 %787 }
 0x242   :  { %v786_v40 = vpop.permute.xlu1 %785 }
 0x253   :  { %644 = vrot.lane.b32.xlu2 %v297_v8, %s1381_s14 }
 0x296   :  { %v461_v20 = vpop.f32.mrf.mxu1 }
 0x297   :  { %v462_v30 = vadd.f32 %v1573_v15, %v461_v20 }
 0x299   :  { %v464_v31 = vsel %vm302_vm8, %v462_v30, -inf }
 0x29e   :  { %v606_v22 = vpop.f32.mrf.mxu1 }
 0x29f   :  { %v607_v23 = vadd.f32 %v1579_v21, %v606_v22 }
 0x2a1   :  { %v609_v24 = vsel %vm302_vm8, %v607_v23, -inf }
 0x2a2   :  { %610 = vmax.xlane.f32.xlu0 %v609_v24 }
 0x2ae   :  { %v331_v25 = vpop.xlane.xlu2 %330 }
 0x2af   :  { %v332_v26 = vsub.f32 %v327_v17, %v331_v25  ;;  %v293_v25 = vpop.f32.mrf.mxu2 }
 0x2b1   :  { %v333_v27 = vmul.f32 1.442695, %v332_v26  ;;  %v294_v26 = vadd.f32 %v1553_v63, %v293_v25 }
 0x2b3   :  { %1207 = vpow2.f32 %v333_v27 }
 0x2b6   :  { %v645_v32 = vpop.permute.xlu2 %644 }
 0x2b9   :  { %v1208_v28 = vpop.eup %1207 }
 0x2ba   :  { %v335_v29 = vsel %vm302_vm8, %v1208_v28, 0.0 }
 0x2bb   :  { %336 = vadd.xlane.f32.xlu2 %v335_v29 }
 0x2d3   :  { %715 = vrot.lane.b32.xlu2 %v297_v8, %s1380_s3 }
 0x2fc   :  { %465 = vmax.xlane.f32.xlu2 %v464_v31 }
 0x315   :  { %v611_v50 = vpop.xlane.xlu0 %610 }
 0x316   :  { %v612_v53 = vsub.f32 %v607_v23, %v611_v50 }
 0x318   :  { %v613_v55 = vmul.f32 1.442695, %v612_v53 }
 0x32e   :  { %v337_v33 = vpop.xlane.xlu2 %336 }
 0x32f   :  { %1209 = vrcp.f32 %v337_v33 }
 0x335   :  { %v1210_v35 = vpop.eup %1209 }
 0x336   :  { %v716_v36 = vpop.permute.xlu2 %715  ;;  %v339_v37 = vmul.f32 %v1210_v35, %v1208_v28 }
 0x337   :  { %1119 = vmatmul.msk.f32.vlgmr.msrb.gmra.mxu1 %vm302_vm8, %v716_v36 }
 0x338   :  { %1102 = vmatmul.msk.f32.vlgmr.msra.gmra.mxu3 %vm302_vm8, %v339_v37 }
 0x339   :  { %1109 = vmatpush.xpose.msk.msra.mxu3 %vm302_vm8, %v510_v34 }
 0x340   :  { %1104 = vmatmul.msk.f32.vlgmr.msrb.gmra.mxu3 %vm302_vm8, %v365_v13 }
 0x341   :  { %1115 = vmatpush.xpose.msk.msrb.mxu3 %vm302_vm8, %v647_v38 }
 0x348   :  { %1110 = vmatmul.msk.f32.vlgmr.msra.gmra.mxu3 %vm302_vm8, %v508_v14 }
 0x349   :  { %1121 = vmatpush.xpose.msk.msra.mxu3 %vm302_vm8, %v788_v39 }
 0x350   :  { %1116 = vmatmul.msk.f32.vlgmr.msrb.gmra.mxu3 %vm302_vm8, %v645_v32 }
 0x358   :  { %1122 = vmatmul.msk.f32.vlgmr.msra.gmra.mxu3 %vm302_vm8, %v786_v40 }
 0x36f   :  { %v466_v41 = vpop.xlane.xlu2 %465 }
 0x370   :  { %v467_v42 = vsub.f32 %v462_v30, %v466_v41 }
 0x372   :  { %v468_v43 = vmul.f32 1.442695, %v467_v42 }
 0x374   :  { %1211 = vpow2.f32 %v468_v43 }
 0x375   :  { %1213 = vpow2.f32 %v613_v55 }
 0x37a   :  { %v1601_v48 = vpop.eup %1211 }
 0x37b   :  { %v470_v49 = vsel %vm302_vm8, %v1601_v48, 0.0  ;;  %v1610_v59 = vpop.eup %1213 }
 0x37c   :  { %v615_v1 = vsel %vm302_vm8, %v1610_v59, 0.0 }
 0x3b4   :  { %v740_v44 = vpop.f32.mrf.mxu1 }
 0x3b5   :  { %v1597_v45 = vadd.f32 %v1579_v21, %v740_v44 }
 0x3b7   :  { %v743_v46 = vsel %vm302_vm8, %v1597_v45, -inf }
 0x3b8   :  { %744 = vmax.xlane.f32.xlu1 %v743_v46 }
 0x3bb   :  { %v360_v47 = vpop.f32.mrf.mxu3 }
 0x3bc   :  { %363 = vst.msk [vmem:[#allocation2] sm:$0xff] %vm302_vm8, %v360_v47 }
 0x3c0   :  { %471 = vadd.xlane.f32.xlu1 %v470_v49 }
 0x3c3   :  { %v389_v51 = vpop.f32.mrf.mxu3 }
 0x3c4   :  { %v390_v52 = vadd.f32 %v1573_v15, %v389_v51 }
 0x3c6   :  { %v392_v54 = vsel %vm302_vm8, %v390_v52, -inf }
 0x3c7   :  { %393 = vmax.xlane.f32.xlu0 %v392_v54 }
 0x3cb   :  { %v532_v56 = vpop.f32.mrf.mxu3 }
 0x3cc   :  { %v533_v57 = vadd.f32 %v1573_v15, %v532_v56 }
 0x3ce   :  { %v535_v58 = vsel %vm302_vm8, %v533_v57, -inf }
 0x3cf   :  { %536 = vmax.xlane.f32.xlu1 %v535_v58 }
 0x3d3   :  { %v669_v60 = vpop.f32.mrf.mxu3 }
 0x3d4   :  { %v670_v61 = vadd.f32 %v1579_v21, %v669_v60 }
 0x3d6   :  { %v672_v62 = vsel %vm302_vm8, %v670_v61, -inf }
 0x3d7   :  { %673 = vmax.xlane.f32.xlu2 %v672_v62  ;;  %616 = vadd.xlane.f32.xlu1 %v615_v1 }
 0x3db   :  { %v810_v4 = vpop.f32.mrf.mxu3 }
 0x3dc   :  { %v811_v5 = vadd.f32 %v1579_v21, %v810_v4 }
 0x3de   :  { %v813_v6 = vsel %vm302_vm8, %v811_v5, -inf }
 0x3df   :  { %814 = vmax.xlane.f32.xlu0 %v813_v6 }
 0x3f0   :  { %546 = vrot.lane.b32.xlu1 %v1558_v3, %s1382_s7 }
 0x42b   :  { %v745_v7 = vpop.xlane.xlu1 %744 }
 0x42c   :  { %v746_v27 = vsub.f32 %v1597_v45, %v745_v7 }
 0x42e   :  { %v747_v29 = vmul.f32 1.442695, %v746_v27 }
 0x433   :  { %v472_v8 = vpop.xlane.xlu1 %471 }
 0x43a   :  { %v394_v9 = vpop.xlane.xlu0 %393 }
 0x43b   :  { %v395_v11 = vsub.f32 %v390_v52, %v394_v9 }
 0x43d   :  { %v396_v12 = vmul.f32 1.442695, %v395_v11  ;;  %v1166_v11 = vld [vmem:[#allocation8 + $0x8] sm:$0xff] }
 0x43e   :  { %887 = vmatpush.bf16.msra.mxu1 %v1166_v11 }
 0x43f   :  { %1215 = vpow2.f32 %v396_v12  ;;  %v1165_v12 = vld [vmem:[#allocation8] sm:$0xff] }
 0x442   :  { %v537_v13 = vpop.xlane.xlu1 %536  ;;  %888 = vmatpush.bf16.msra.mxu1 %v1165_v12 }
 0x443   :  { %v538_v14 = vsub.f32 %v533_v57, %v537_v13 }
 0x445   :  { %v1216_v15 = vpop.eup %1215  ;;  %v539_v16 = vmul.f32 1.442695, %v538_v14 }
 0x446   :  { %v398_v17 = vsel %vm302_vm8, %v1216_v15, 0.0 }
 0x447   :  { %1217 = vpow2.f32 %v539_v16  ;;  %399 = vadd.xlane.f32.xlu2 %v398_v17 }
 0x44a   :  { %v674_v18 = vpop.xlane.xlu2 %673  ;;  %v617_v35 = vpop.xlane.xlu1 %616 }
 0x44b   :  { %v675_v19 = vsub.f32 %v670_v61, %v674_v18 }
 0x44d   :  { %v1218_v20 = vpop.eup %1217  ;;  %v676_v21 = vmul.f32 1.442695, %v675_v19  ;;  %v1196_v19 = vld [vmem:[%s1714_s11] ss:$0 sm:$0xff] }
 0x44e   :  { %v541_v22 = vsel %vm302_vm8, %v1218_v20, 0.0 }
 0x44f   :  { %1219 = vpow2.f32 %v676_v21  ;;  %542 = vadd.xlane.f32.xlu0 %v541_v22 }
 0x450   :  { %1221 = vpow2.f32 %v747_v29 }
 0x452   :  { %v815_v28 = vpop.xlane.xlu0 %814 }
 0x453   :  { %v816_v30 = vsub.f32 %v811_v5, %v815_v28 }
 0x455   :  { %v1220_v23 = vpop.eup %1219  ;;  %v817_v31 = vmul.f32 1.442695, %v816_v30 }
 0x456   :  { %v678_v24 = vsel %vm302_vm8, %v1220_v23, 0.0  ;;  %v1222_v32 = vpop.eup %1221 }
 0x457   :  { %679 = vadd.xlane.f32.xlu1 %v678_v24  ;;  %1223 = vpow2.f32 %v817_v31 }
 0x45d   :  { %v1224_v33 = vpop.eup %1223 }
 0x45e   :  { %v819_v63 = vsel %vm302_vm8, %v1224_v33, 0.0 }
 0x45f   :  { %404 = vrot.lane.b32.xlu2 %v1558_v3, %s1381_s14 }
 0x462   :  { %v547_v40 = vpop.permute.xlu1 %546 }
 0x463   :  { %475 = vrot.lane.b32.xlu0 %v1558_v3, %s1380_s3  ;;  %v749_v3 = vsel %vm302_vm8, %v1222_v32, 0.0 }
 0x470   :  { %684 = vrot.lane.b32.xlu1 %v294_v26, %s1381_s14 }
 0x478   :  { %754 = vrot.lane.b32.xlu1 %v294_v26, %s1380_s3  ;;  %s1058_s3 = sshll.u32 %s1721_s18, 4  ;;  %s1059_s3 = int_to_ptr.hbm [resolvable:$true] %s1058_s3 }
 0x480   :  { %824 = vrot.lane.b32.xlu1 %v294_v26, %s1382_s7 }
 0x488   :  { %750 = vadd.xlane.f32.xlu2 %v749_v3 }
 0x48d   :  { %820 = vadd.xlane.f32.xlu0 %v819_v63 }
 0x4ba   :  { %v400_v34 = vpop.xlane.xlu2 %399 }
 0x4bb   :  { %1225 = vrcp.f32 %v400_v34  ;;  %v1168_v34 = vld [vmem:[#allocation9 + $0x8] sm:$0xff] }
 0x4c1   :  { %v1226_v36 = vpop.eup %1225 }
 0x4c2   :  { %v402_v37 = vmul.f32 %v1226_v36, %v1216_v15  ;;  %v543_v38 = vpop.xlane.xlu0 %542  ;;  %v405_v39 = vpop.permute.xlu2 %404 }
 0x4c3   :  { %1227 = vrcp.f32 %v543_v38  ;;  %425 = vmatpush.msra.mxu0 %v405_v39  ;;  %v1167_v38 = vld [vmem:[#allocation9] sm:$0xff] }
 0x4c4   :  { %1105 = vmatmul.msk.f32.vlgmr.msra.gmra.mxu0 %vm302_vm8, %v402_v37  ;;  %1229 = vrcp.f32 %v472_v8 }
 0x4c5   :  { %567 = vmatpush.msrb.mxu0 %v547_v40  ;;  %1231 = vrcp.f32 %v617_v35 }
 0x4c9   :  { %v1228_v41 = vpop.eup %1227 }
 0x4ca   :  { %v545_v42 = vmul.f32 %v1228_v41, %v1218_v20  ;;  %v1230_v43 = vpop.eup %1229  ;;  %v680_v46 = vpop.xlane.xlu1 %679 }
 0x4cb   :  { %v474_v45 = vmul.f32 %v1230_v43, %v1601_v48  ;;  %1233 = vrcp.f32 %v680_v46  ;;  %v1232_v47 = vpop.eup %1231 }
 0x4cc   :  { %1111 = vmatmul.msk.f32.vlgmr.msrb.gmra.mxu0 %vm302_vm8, %v545_v42  ;;  %v619_v49 = vmul.f32 %v1232_v47, %v1610_v59 }
 0x4d1   :  { %v1234_v50 = vpop.eup %1233 }
 0x4d2   :  { %v682_v51 = vmul.f32 %v1234_v50, %v1220_v23 }
 0x4d5   :  { %v476_v44 = vpop.permute.xlu0 %475 }
 0x4d6   :  { %496 = vmatpush.msrb.mxu2 %v476_v44 }
 0x4d7   :  { %1108 = vmatmul.msk.f32.vlgmr.msrb.gmra.mxu2 %vm302_vm8, %v474_v45 }
 0x4d8   :  { %638 = vmatpush.msra.mxu2 %v294_v26 }
 0x4df   :  { %1114 = vmatmul.msk.f32.vlgmr.msra.gmra.mxu2 %vm302_vm8, %v619_v49 }
 0x4e2   :  { %v685_v52 = vpop.permute.xlu1 %684 }
 0x4e3   :  { %705 = vmatpush.msra.mxu0 %v685_v52 }
 0x4e4   :  { %1117 = vmatmul.msk.f32.vlgmr.msra.gmra.mxu0 %vm302_vm8, %v682_v51 }
 0x4ea   :  { %v755_v53 = vpop.permute.xlu1 %754 }
 0x4eb   :  { %775 = vmatpush.msrb.mxu2 %v755_v53 }
 0x4ed   :  { %983 = vmatpush.bf16.msra.mxu2 %v1168_v34 }
 0x4f1   :  { %984 = vmatpush.bf16.msra.mxu2 %v1167_v38 }
 0x4f2   :  { %v825_v48 = vpop.permute.xlu1 %824 }
 0x4f3   :  { %845 = vmatpush.msrb.mxu0 %v825_v48 }
 0x4fb   :  { %v751_v54 = vpop.xlane.xlu2 %750 }
 0x4fc   :  { %1235 = vrcp.f32 %v751_v54 }
 0x500   :  { %v821_v55 = vpop.xlane.xlu0 %820 }
 0x501   :  { %1237 = vrcp.f32 %v821_v55 }
 0x502   :  { %v1236_v56 = vpop.eup %1235 }
 0x503   :  { %v753_v57 = vmul.f32 %v1236_v56, %v1222_v32 }
 0x505   :  { %1120 = vmatmul.msk.f32.vlgmr.msrb.gmra.mxu2 %vm302_vm8, %v753_v57  ;;  %v1198_v57 = vld [vmem:[%s1716_s13] ss:$0 sm:$0xff] }
 0x507   :  { %v1238_v58 = vpop.eup %1237 }
 0x508   :  { %v823_v59 = vmul.f32 %v1238_v58, %v1224_v33 }
 0x50a   :  { %1123 = vmatmul.msk.f32.vlgmr.msrb.gmra.mxu0 %vm302_vm8, %v823_v59 }
 0x541   :  { %v427_v60 = vpop.f32.mrf.mxu0 }
 0x542   :  { %431 = vrot.lane.b32.xlu2 %v427_v60, %s1383_s9 }
 0x549   :  { %v569_v61 = vpop.f32.mrf.mxu0 }
 0x55a   :  { %v498_v62 = vpop.f32.mrf.mxu2 }
 0x55b   :  { %502 = vrot.lane.b32.xlu1 %v498_v62, %s1375_s25 }
 0x561   :  { %v707_v1 = vpop.f32.mrf.mxu0 }
 0x562   :  { %v640_v4 = vpop.f32.mrf.mxu2  ;;  %711 = vrot.lane.b32.xlu0 %v707_v1, %s1383_s9 }
 0x563   :  { %643 = vst.msk [vmem:[#allocation2 + $0x8] sm:$0xff] %vm302_vm8, %v640_v4  ;;  %v1172_v4 = vld [vmem:[%s1719_s16 + $0x18] sm:$0xff] }
 0x564   :  { %1038 = vmatpush.bf16.msrb.mxu3 %v1172_v4 }
 0x587   :  { %v847_v5 = vpop.f32.mrf.mxu0 }
 0x588   :  { %851 = vrot.lane.b32.xlu0 %v847_v5, %s1384_s22  ;;  %v777_v6 = vpop.f32.mrf.mxu2  ;;  %v1171_v5 = vld [vmem:[%s1719_s16 + $0x10] sm:$0xff] }
 0x589   :  { %781 = vrot.lane.b32.xlu1 %v777_v6, %s1375_s25  ;;  %1039 = vmatpush.bf16.msrb.mxu3 %v1171_v5  ;;  %v1170_v6 = vld [vmem:[%s1719_s16 + $0x8] sm:$0xff] }
 0x58d   :  { %1040 = vmatpush.bf16.msrb.mxu3 %v1170_v6 }
 0x591   :  { %573 = vrot.lane.b32.xlu1 %v569_v61, %s1384_s22 }
 0x59c   :  { %v432_v7 = vpop.permute.xlu2 %431 }
 0x59d   :  { %435 = vst.msk [vmem:[#allocation2] sm:$0xff] %vm434_vm9, %v432_v7  ;;  %v1169_v7 = vld [vmem:[%s1719_s16] sm:$0xff]  ;;  %s1385_s16 = smov [#allocation11]  }
 0x59e   :  { %1041 = vmatpush.bf16.msrb.mxu3 %v1169_v7 }
 0x5cd   :  { %v503_v8 = vpop.permute.xlu1 %502 }
 0x5ce   :  { %506 = vst.msk [vmem:[#allocation2] sm:$0xff] %vm505_vm10, %v503_v8 }
 0x5d4   :  { %v712_v9 = vpop.permute.xlu0 %711 }
 0x5d5   :  { %714 = vst.msk [vmem:[#allocation2 + $0x8] sm:$0xff] %vm434_vm9, %v712_v9  ;;  %v1199_v9 = vld [vmem:[%s1718_s15] ss:$0 sm:$0xff]  ;;  %s1056_s15 = sshll.u32 %s1385_s16, 4  ;;  %s1057_s15 = int_to_ptr.vmem [resolvable:$true] %s1056_s15 }
 0x5fa   :  { %v852_v14 = vpop.permute.xlu0 %851 }
 0x5fb   :  { %v782_v13 = vpop.permute.xlu1 %781 }
 0x5fc   :  { %784 = vst.msk [vmem:[#allocation2 + $0x8] sm:$0xff] %vm505_vm10, %v782_v13 }
 0x5fd   :  { %854 = vst.msk [vmem:[#allocation2 + $0x8] sm:$0xff] %vm576_vm11, %v852_v14 }
 0x603   :  { %v574_v15 = vpop.permute.xlu1 %573 }
 0x604   :  { %577 = vst.msk [vmem:[#allocation2] sm:$0xff] %vm576_vm11, %v574_v15  ;;  %v856_v17 = vld [vmem:[#allocation2 + $0x8] sm:$0xff] }
 0x60b   :  { %v855_v16 = vld [vmem:[#allocation2] sm:$0xff] }
 0x60c   :  { %v857_v18 = vpack.c.bf16 %v856_v17, %v855_v16  ;;  %v1200_v17 = vld [vmem:[%s1720_s17] ss:$0 sm:$0xff]  ;;  %s1386_s17 = smov 128  }
 0x60e   :  { %1132 = vmatmul.msk.bf16.vlgmr.msra.gmra.mxu1 %vm128_vm0, %v857_v18 }
 0x68b   :  { %v890_v20 = vpop.f32.mrf.mxu1 }
 0x68c   :  { %v891_v21 = vadd.f32 %v1196_v19, %v890_v20 }
 0x68e   :  { %v1653_v22 = vadd.f32 %v891_v21, %v1499_v0 }
 0x690   :  { %v899_v23 = vsel %vm128_vm0, %v1653_v22, 0.0 }
 0x691   :  { %900 = vadd.xlane.f32.xlu2 %v899_v23 }
 0x693   :  { %v892_v24 = vpop.f32.mrf.mxu1 }
 0x694   :  { %v893_v25 = vadd.f32 %v1196_v19, %v892_v24 }
 0x696   :  { %v1658_v26 = vadd.f32 %v893_v25, %v1506_v2 }
 0x698   :  { %v902_v27 = vsel %vm128_vm0, %v1658_v26, 0.0 }
 0x699   :  { %903 = vadd.xlane.f32.xlu1 %v902_v27 }
 0x704   :  { %v901_v28 = vpop.xlane.xlu2 %900 }
 0x705   :  { %v905_v29 = vmul.f32 %v901_v28, %v1510_v10 }
 0x707   :  { %v907_v30 = vsub.f32 %v1653_v22, %v905_v29 }
 0x709   :  { %v909_v0 = vmul.f32 %v907_v30, %v907_v30 }
 0x70b   :  { %v911_v31 = vsel %vm128_vm0, %v909_v0, 0.0 }
 0x70c   :  { %v904_v32 = vpop.xlane.xlu1 %903  ;;  %912 = vadd.xlane.f32.xlu0 %v911_v31 }
 0x70d   :  { %v906_v3 = vmul.f32 %v904_v32, %v1510_v10 }
 0x70f   :  { %v908_v33 = vsub.f32 %v1658_v26, %v906_v3 }
 0x711   :  { %v910_v2 = vmul.f32 %v908_v33, %v908_v33 }
 0x713   :  { %v914_v63 = vsel %vm128_vm0, %v910_v2, 0.0 }
 0x714   :  { %915 = vadd.xlane.f32.xlu2 %v914_v63 }
 0x77f   :  { %v913_v35 = vpop.xlane.xlu0 %912 }
 0x780   :  { %v917_v36 = vmul.f32 %v913_v35, %v1510_v10 }
 0x782   :  { %v919_v37 = vadd.f32 1e-05, %v917_v36 }
 0x784   :  { %1239 = vrsqrt.f32 %v919_v37  ;;  %vm927_vm13 = vweird.f32 %v919_v37 }
 0x787   :  { %v916_v39 = vpop.xlane.xlu2 %915 }
 0x788   :  { %v918_v40 = vmul.f32 %v916_v39, %v1510_v10  ;;  %v1197_v10 = vld [vmem:[%s1715_s12] ss:$0 sm:$0xff] }
 0x78a   :  { %v1240_v41 = vpop.eup %1239  ;;  %v920_v42 = vadd.f32 1e-05, %v918_v40 }
 0x78b   :  { %v922_v43 = vmul.f32 %v1240_v41, %v919_v37  ;;  %vm928_vm12 = vweird.f32 %v1240_v41 }
 0x78c   :  { %1241 = vrsqrt.f32 %v920_v42  ;;  %vm929_vm14 = vmor %vm927_vm13, %vm928_vm12  ;;  %vm937_vm1 = vweird.f32 %v920_v42 }
 0x78d   :  { %v923_v44 = vmul.f32 %v1240_v41, %v922_v43 }
 0x78f   :  { %v924_v45 = vmul.f32 0.5, %v923_v44 }
 0x791   :  { %v925_v46 = vsub.f32 1.5, %v924_v45 }
 0x792   :  { %v1242_v47 = vpop.eup %1241 }
 0x793   :  { %v926_v49 = vmul.f32 %v1240_v41, %v925_v46  ;;  %v932_v50 = vmul.f32 %v1242_v47, %v920_v42  ;;  %vm938_vm15 = vweird.f32 %v1242_v47 }
 0x794   :  { %vm939_vm2 = vmor %vm937_vm1, %vm938_vm15 }
 0x795   :  { %v933_v51 = vmul.f32 %v1242_v47, %v932_v50  ;;  %v930_v52 = vsel %vm929_vm14, %v1240_v41, %v926_v49 }
 0x796   :  { %v941_v54 = vmul.f32 %v930_v52, %v907_v30 }
 0x797   :  { %v934_v53 = vmul.f32 0.5, %v933_v51 }
 0x798   :  { %v946_v58 = vmul.f32 %v1197_v10, %v941_v54 }
 0x799   :  { %v935_v48 = vsub.f32 1.5, %v934_v53 }
 0x79a   :  { %v951_v61 = vadd.f32 %v1198_v57, %v946_v58 }
 0x79b   :  { %v936_v55 = vmul.f32 %v1242_v47, %v935_v48 }
 0x79d   :  { %v940_v56 = vsel %vm939_vm2, %v1242_v47, %v936_v55 }
 0x79e   :  { %v942_v59 = vmul.f32 %v940_v56, %v908_v33 }
 0x7a0   :  { %v947_v60 = vmul.f32 %v1197_v10, %v942_v59 }
 0x7a2   :  { %v952_v62 = vadd.f32 %v1198_v57, %v947_v60 }
 0x7a4   :  { %v953_v1 = vpack.c.bf16 %v952_v62, %v951_v61 }
 0x7a6   :  { %1141 = vmatmul.msk.bf16.vlgmr.msra.gmra.mxu2 %vm128_vm0, %v953_v1 }
 0x829   :  { %v986_v8 = vpop.f32.mrf.mxu2 }
 0x82a   :  { %v987_v11 = vadd.f32 %v1199_v9, %v986_v8 }
 0x82c   :  { %v991_v14 = vmax.f32 %v987_v11, 0.0 }
 0x831   :  { %v988_v12 = vpop.f32.mrf.mxu2 }
 0x832   :  { %v989_v13 = vadd.f32 %v1199_v9, %v988_v12 }
 0x834   :  { %v992_v15 = vmax.f32 %v989_v13, 0.0 }
 0x836   :  { %v993_v16 = vpack.c.bf16 %v992_v15, %v991_v14 }
 0x838   :  { %1158 = vmatmul.msk.bf16.vlgmr.msrb.gmra.mxu3 %vm1030_vm3, %v993_v16 }
 0x8bb   :  { %v1043_v18 = vpop.f32.mrf.mxu3 }
 0x8bc   :  { %v1044_v19 = vadd.f32 %v1200_v17, %v1043_v18 }
 0x8be   :  { %v1048_v20 = vadd.f32 %v1044_v19, %v1653_v22 }
 0x8c0   :  { %1050 = vst.msk [vmem:[#allocation11] sm:$0xff] %vm128_vm0, %v1048_v20 }
 0x8c3   :  { %v1045_v21 = vpop.f32.mrf.mxu3 }
 0x8c4   :  { %v1046_v23 = vadd.f32 %v1200_v17, %v1045_v21 }
 0x8c6   :  { %v1049_v24 = vadd.f32 %v1046_v23, %v1658_v26 }
 0x8c8   :  { %1051 = vst.msk [vmem:[#allocation11 + $0x8] sm:$0xff] %vm128_vm0, %v1049_v24 }
 0x8c9   :  { %1064 = dma.vmem_to_hbm [thread:$0]  %s1057_s15, 256, %s1059_s3, [#allocation5], %s1386_s17, %s1386_s17, %s1383_s9  }
 0x8ca   :  { %1369 = dma.done.wait [#allocation5], 256  }
 0x8cb   :  { %1370 = vsyncadd [#allocation5], 4294967040 }
 0x8cc   :  { %1069 = vsyncpa [#allocation4], 1 }
 0x8cd   :  { %1070 = vsyncpa [#allocation7], 1 }
 0x8ce   :  { %1071 = vsyncpa [#allocation10], 1 }
 0x8cf   :  { %1072 = vsyncpa [#allocation5], 1 }

</bundles_post_ra>
